<compile_context>
chip_gen: v5e
topology: v5e:2x2
jax: 0.10.0
libtpu: 0.0.40
codegen_flags: <defaults>
</compile_context>

<pallas_src>
import functools

import jax
import jax.numpy as jnp
from jax.experimental import pallas as pl
from jax.experimental.pallas import tpu as pltpu


def _matmul_bias_kernel(x_ref, w_ref, b_ref, o_ref):
    # x_ref: (tm, d), w_ref: (d, tn), b_ref: (1, tn), o_ref: (tm, tn)
    acc = jnp.dot(x_ref[...], w_ref[...], preferred_element_type=jnp.float32)
    o_ref[...] = (acc + b_ref[...].astype(jnp.float32)).astype(o_ref.dtype)


def _cayley_weight(angles, dim):
    iu, ju = jnp.triu_indices(dim, k=1)
    A = jnp.zeros((dim, dim), dtype=angles.dtype)
    A = A.at[iu, ju].set(angles)
    A = A.at[ju, iu].set(-angles)
    I = jnp.eye(dim, dtype=angles.dtype)
    # torch.linalg.solve(I - A, I + A)  <=>  (I - A) W = (I + A)
    return jnp.linalg.solve(I - A, I + A)


def _round_up(n, m):
    return ((n + m - 1) // m) * m


_X_BLOCK_BYTES = 2 * 1024 * 1024   # target streamed x tile (per buffer)
_W_PANEL_BYTES = 4 * 1024 * 1024   # max resident W panel (per buffer)


def _tiled_matmul_bias(x, w, b2d, out_dtype):
    """y = x @ w + b2d via a Pallas kernel.  x: (M, d), w: (d, n), b2d: (1, n)."""
    M, d = x.shape
    n = w.shape[1]
    itemsize = jnp.dtype(x.dtype).itemsize
    sub = {4: 8, 2: 16, 1: 32}.get(itemsize, 8)   # sublane multiple per dtype

    # N-tiling bounds the resident W panel (scales past any single-buffer VMEM
    # budget without a K reduction axis; both grid axes stay "parallel").
    if d * n * itemsize <= _W_PANEL_BYTES or n <= 128:
        tn = n
    else:
        tn = max(128, (_W_PANEL_BYTES // (d * itemsize)) // 128 * 128)
        tn = min(tn, n)

    # M-tiling: ~2 MiB streamed x tile to amortize per-grid-step overhead.
    tm = max(sub, (_X_BLOCK_BYTES // (d * itemsize)) // sub * sub)
    if tm >= M:
        tm = M
        # v7x has two TensorCores: never leave the grid at a single step if we
        # can split the batch (also keeps the in/out pipeline active).
        if pl.cdiv(n, tn) == 1 and M >= 2 * sub:
            tm = _round_up(pl.cdiv(M, 2), sub)
    grid = (pl.cdiv(M, tm), pl.cdiv(n, tn))

    # Double-buffered x, y and W panels plus bias; ask for enough scoped VMEM
    # (v5e default is only 16 MiB) while staying well under v7x's 64 MiB.
    est_vmem = 2 * (tm * d + tm * tn + d * tn + tn) * itemsize
    vmem_limit = int(min(max(32 * 1024 * 1024, est_vmem * 5 // 4),
                         48 * 1024 * 1024))

    cost = pl.CostEstimate(
        flops=2 * M * d * n,
        transcendentals=0,
        bytes_accessed=(M * d + M * n + d * n + n) * itemsize,
    )

    return pl.pallas_call(
        _matmul_bias_kernel,
        out_shape=jax.ShapeDtypeStruct((M, n), out_dtype),
        grid=grid,
        in_specs=[
            pl.BlockSpec((tm, d), lambda i, j: (i, 0)),   # x tile (resident over j)
            pl.BlockSpec((d, tn), lambda i, j: (0, j)),   # W panel
            pl.BlockSpec((1, tn), lambda i, j: (0, j)),   # bias
        ],
        out_specs=pl.BlockSpec((tm, tn), lambda i, j: (i, j)),
        compiler_params=pltpu.CompilerParams(
            dimension_semantics=("parallel", "parallel"),
            vmem_limit_bytes=vmem_limit,
        ),
        cost_estimate=cost,
    )(x, w, b2d)


def cayley_linear_forward(x, angles, bias, dim, *, compute_dtype=None):
    """CayleyLinear forward.  x: (..., dim), angles: (dim*(dim-1)//2,), bias: (dim,)."""
    assert x.shape[-1] == dim
    lead = x.shape[:-1]
    x2 = x.reshape(-1, dim)
    M = x2.shape[0]

    W = _cayley_weight(angles, dim)
    out_dtype = compute_dtype if compute_dtype is not None else x.dtype
    if compute_dtype is not None:
        # Bandwidth-bound GEMM: casting x / W halves HBM bytes; accumulation
        # and the bias add stay in f32 inside the kernel.
        x2 = x2.astype(compute_dtype)
        W = W.astype(compute_dtype)
    bias_f32 = bias.astype(jnp.float32)

    # Lane-dense packing for small dim: reshape x (M, dim) -> (M*dim/128, 128)
    # (row-major contiguous, so free) and multiply by the block-diagonal
    # W_blk = kron(I_{128/dim}, W).  Full 128-lane stores / MXU columns with no
    # wrapper transposes.
    if dim < 128 and 128 % dim == 0 and (M * dim) % 128 == 0 and M * dim >= 128:
        r = 128 // dim
        xp = x2.reshape((M * dim) // 128, 128)
        w_blk = jnp.kron(jnp.eye(r, dtype=W.dtype), W)
        b_blk = jnp.tile(bias_f32, r).reshape(1, 128)
        yp = _tiled_matmul_bias(xp, w_blk, b_blk, out_dtype)
        return yp.reshape(lead + (dim,))

    # Direct layout: features on lanes.
    b2d = bias_f32.reshape(1, dim)
    y = _tiled_matmul_bias(x2, W, b2d, out_dtype)
    return y.reshape(lead + (dim,))


def _reference(x, angles, bias, dim):
    W = _cayley_weight(angles, dim)
    return x @ W + bias


if __name__ == "__main__":
    key = jax.random.PRNGKey(0)

    def run_case(batch, dim, compute_dtype=None, tol=1e-4):
        k = jax.random.fold_in(key, batch * 1000 + dim)
        k_ang, k_b, k_x = jax.random.split(k, 3)
        num_params = dim * (dim - 1) // 2
        angles = jax.random.normal(k_ang, (num_params,), dtype=jnp.float32) * 0.01
        bias = jax.random.normal(k_b, (dim,), dtype=jnp.float32) * 0.1
        x = jax.random.normal(k_x, (batch, dim), dtype=jnp.float32)

        fwd = jax.jit(functools.partial(cayley_linear_forward, dim=dim,
                                        compute_dtype=compute_dtype))
        y = jax.block_until_ready(fwd(x, angles, bias))
        y_ref = _reference(x, angles, bias, dim)
        assert jnp.allclose(y.astype(jnp.float32), y_ref, atol=tol, rtol=tol), (
            f"mismatch vs reference (batch={batch}, dim={dim}, dtype={compute_dtype})"
        )
        return y

    # Small demo (module defaults): block-diag lane-dense path, single grid step.
    run_case(batch=8, dim=32)
    # Block-diag lane-dense path with a 2-step "parallel" grid (both v7x TCs busy).
    run_case(batch=256, dim=32)
    # Direct path, dim on lanes, batch split across 2 grid steps.
    run_case(batch=512, dim=128)
    # Direct path with a non-128-multiple dim and a ragged trailing tile.
    run_case(batch=200, dim=48)
    # Optional bf16 compute mode (halves HBM bytes for this bandwidth-bound GEMM).
    run_case(batch=256, dim=64, compute_dtype=jnp.bfloat16, tol=5e-2)

    print("KERNEL_OK")
</pallas_src>

<mosaic_0001>
module attributes {stable_mosaic.version = 11 : i64} {
  func.func @_matmul_bias_kernel(%arg0: i32, %arg1: i32, %arg2: memref<2x128xf32, #tpu.memory_space<vmem>>, %arg3: memref<128x128xf32, #tpu.memory_space<vmem>>, %arg4: memref<1x128xf32, #tpu.memory_space<vmem>>, %arg5: memref<2x128xf32, #tpu.memory_space<vmem>>) attributes {dimension_semantics = [#tpu.dimension_semantics<parallel>, #tpu.dimension_semantics<parallel>], iteration_bounds = array<i64: 1, 1>, scalar_prefetch = 0 : i64, scratch_operands = 0 : i64, tpu.core_type = #tpu.core_type<tc>, window_params = [{transform_indices = @transform_0, window_bounds = array<i64: 2, 128>}, {transform_indices = @transform_1, window_bounds = array<i64: 128, 128>}, {transform_indices = @transform_2, window_bounds = array<i64: 1, 128>}, {transform_indices = @transform_3, window_bounds = array<i64: 2, 128>}]} {
    %c0 = arith.constant 0 : index
    %c0_0 = arith.constant 0 : index
    %0 = vector.load %arg2[%c0, %c0_0] : memref<2x128xf32, #tpu.memory_space<vmem>>, vector<2x128xf32>
    %c0_1 = arith.constant 0 : index
    %c0_2 = arith.constant 0 : index
    %1 = vector.load %arg3[%c0_1, %c0_2] : memref<128x128xf32, #tpu.memory_space<vmem>>, vector<128x128xf32>
    %cst = arith.constant dense<0.000000e+00> : vector<2x128xf32>
    %2 = tpu.matmul %0, %1, %cst {dimension_numbers = #tpu.dot_dimension_numbers<[1], [0], [0], [1], [0, 0, 1, 1], [], []>} : vector<2x128xf32>, vector<128x128xf32>, vector<2x128xf32> -> vector<2x128xf32>
    %c0_3 = arith.constant 0 : index
    %c0_4 = arith.constant 0 : index
    %3 = vector.load %arg4[%c0_3, %c0_4] : memref<1x128xf32, #tpu.memory_space<vmem>>, vector<1x128xf32>
    %4 = vector.broadcast %3 : vector<1x128xf32> to vector<2x128xf32>
    %5 = arith.addf %2, %4 : vector<2x128xf32>
    %c0_5 = arith.constant 0 : index
    %c0_6 = arith.constant 0 : index
    %6 = vector.load %arg5[%c0_5, %c0_6] : memref<2x128xf32, #tpu.memory_space<vmem>>, vector<2x128xf32>
    tpu.vector_store %arg5[%c0_5, %c0_6], %5 {strides = array<i32>} : memref<2x128xf32, #tpu.memory_space<vmem>>, vector<2x128xf32>,
    return
  }
  func.func @transform_0(%arg0: i32, %arg1: i32) -> (i32, i32) {
    %c0_i32 = arith.constant 0 : i32
    %c0_i32_0 = arith.constant 0 : i32
    return %arg0, %c0_i32 : i32, i32
  }
  func.func @transform_1(%arg0: i32, %arg1: i32) -> (i32, i32) {
    %c0_i32 = arith.constant 0 : i32
    %c0_i32_0 = arith.constant 0 : i32
    return %c0_i32, %arg1 : i32, i32
  }
  func.func @transform_2(%arg0: i32, %arg1: i32) -> (i32, i32) {
    %c0_i32 = arith.constant 0 : i32
    %c0_i32_0 = arith.constant 0 : i32
    return %c0_i32, %arg1 : i32, i32
  }
  func.func @transform_3(%arg0: i32, %arg1: i32) -> (i32, i32) {
    %c0_i32 = arith.constant 0 : i32
    return %arg0, %arg1 : i32, i32
  }
}

</mosaic_0001>

<bundles_post_ra>
// kernel: neg.1
= control target key start
LH: loop header
LB: loop body
LE: loop exit
PB: predicated region body
PF: predicated region fallthrough
CT: control target
= control target key end

     0   :  { %s24_s0 = inlined_call_operand.vmem [shape: f32[496], index: 0, kind: input, shape index: {}]   ;;  %s25_s1 = inlined_call_operand.vmem [shape: f32[496], index: 1, kind: output, shape index: {}]  }
   0x1   :  { %v2_v0 = vld [vmem:[%s24_s0] sm:$0xf] }
   0x2   :  { %v5_v1 = vxor.u32 2147483648, %v2_v0 }
   0x4   :  { %7 = vst [vmem:[%s25_s1] sm:$0xf] %v5_v1 }

// kernel: custom-call.8
= control target key start
LH: loop header
LB: loop body
LE: loop exit
PB: predicated region body
PF: predicated region fallthrough
CT: control target
= control target key end

     0   :  { %5 = vsyncpa [#allocation4], 0  ;;  %s1064_s0 = inlined_call_operand.vmem [shape: f32[32,32], index: 0, kind: input, shape index: {}]   ;;  %s1065_s1 = inlined_call_operand.vmem [shape: f32[32,32], index: 1, kind: output, shape index: {0}]   ;;  %s1066_s2 = inlined_call_operand.hbm [shape: s32[32], index: 2, kind: output, shape index: {1}]   ;;  %s1067_s3 = inlined_call_operand.vmem [shape: s32[32], index: 3, kind: output, shape index: {2}]  }
   0x1   :  { %s15_s14 = scalar_lea.vmem %s1064_s0, 24 }
   0x2   :  { %p556_p0 = scmp.gt.s32.totalorder %s1064_s0, %s15_s14 }
   0x3   :  { %s855_s17 = smov (!%p556_p0), [#allocation0]   ;;  %s859_s20 = smov (!%p556_p0), %s1064_s0  }
   0x4   :  { %557 = sbr.rel (%p556_p0) target bundleno = 17 (0x11), region = 165 }
   0x9 LB: > { %v49_v0 = vld [vmem:[%s861_s20] sm:$0xff]  ;;  %s51_s20 = scalar_lea.vmem %s861_s20, 8   ;;  %s861_s20 = sphi %s859_s20, %s51_s20   ;;  %s857_s17 = sphi %s855_s17, %s52_s17  }
   0xa   : > { %50 = vst [vmem:[%s857_s17] sm:$0xff] %v49_v0  ;;  %s52_s17 = scalar_lea.vmem %s857_s17, 8   ;;  %p46_p1 = scmp.gt.s32.totalorder %s51_s20, %s15_s14 }
   0xc   :  { %48 = sbr.rel (!%p46_p1) target bundleno = 9 (0x9), region = 171 }
  0x11 PF:  { %v62_v1 = vld [vmem:[#allocation0] sm:$0xff]  ;;  %v66_v2 = vld [vmem:[#allocation0 + $0x8] sm:$0xff]  ;;  %v70_v3 = vld [vmem:[#allocation0 + $0x10] sm:$0xff]  ;;  %v77_v4 = vlaneseq  ;;  %v879_v7 = vmov 0   ;;  %s863_s0 = smov 0  }
  0x12   :  { %63 = vst [vmem:[#allocation1] sm:$0xff] %v62_v1  ;;  %v74_v5 = vld [vmem:[#allocation0 + $0x18] sm:$0xff] }
  0x13   :  { %67 = vst [vmem:[#allocation1 + $0x8] sm:$0xff] %v66_v2  ;;  %v911_v6 = vshrl.u32 %v77_v4, 7 }
  0x14   :  { %71 = vst [vmem:[#allocation1 + $0x10] sm:$0xff] %v70_v3 }
  0x15   :  { %75 = vst [vmem:[#allocation1 + $0x18] sm:$0xff] %v74_v5 }
  0x16   :  { %76 = vst [vmem:[#allocation2] sm:$0x1] %v879_v7 }
  0x17 LB: > { %s614_s21 = sshll.u32 %s865_s0, 3  ;;  %s85_s0 = sadd.s32 1, %s865_s0   ;;  %s865_s0 = sphi %s863_s0, %s85_s0  }
  0x18   : > { %v89_v8 = vstv %s614_s21  ;;  %s87_s22 = scalar_lea.vmem [#allocation7], %s614_s21  ;;  %p82_p2 = scmp.ge.s32.totalorder %s85_s0, 4  }
  0x19   : > { %v90_v9 = vadd.s32 %v89_v8, %v911_v6  ;;  %s914_s23 = smov (%p82_p2), 0  }
  0x1a   :  { %84 = sbr.rel (!%p82_p2) target bundleno = 23 (0x17), region = 182 }
  0x1b   : > { %91 = vst [vmem:[%s87_s22] sm:$0xff] %v90_v9 }
  0x1f LB: > { %v102_v10 = vld [vmem:[#allocation1] sm:$0xff]  ;;  %v114_v11 = vld [vmem:[#allocation1 + $0x8] sm:$0xff]  ;;  %v920_v12 = vadd.s32 8, %v911_v6  ;;  %v923_v14 = vstv %s869_s23  ;;  %v126_v16 = vld [vmem:[#allocation1 + $0x10] sm:$0xff]  ;;  %v928_v17 = vadd.s32 16, %v911_v6  ;;  %v935_v22 = vadd.s32 24, %v911_v6  ;;  %s869_s23 = sphi %s914_s23, %s97_s23  }
  0x20   : > { %v103_v13 = vand.u32 2147483647, %v102_v10  ;;  %v115_v15 = vand.u32 2147483647, %v114_v11  ;;  %vm106_vm0 = vcmp.ge.s32.totalorder %v911_v6, %v923_v14  ;;  %v127_v20 = vand.u32 2147483647, %v126_v16 }
  0x21   : > { %vm118_vm3 = vcmp.ge.s32.totalorder %v920_v12, %v923_v14  ;;  %v138_v21 = vld [vmem:[#allocation1 + $0x18] sm:$0xff]  ;;  %vm130_vm6 = vcmp.ge.s32.totalorder %v928_v17, %v923_v14  ;;  %vm142_vm9 = vcmp.ge.s32.totalorder %v935_v22, %v923_v14  ;;  %s184_s24 = ssub.s32 128, %s869_s23  ;;  %v946_v58 = vand.u32 127, %v77_v4  ;;  %v193_v60 = vld [vmem:[#allocation2] ss:$0 sm:$0xff]  ;;  %s196_s26 = scalar_lea.vmem [#allocation1], %s869_s23 }
  0x22   : > { %vm616_vm1 = vcmp.gt.f32.partialorder %v103_v13, -inf  ;;  %v139_v25 = vand.u32 2147483647, %v138_v21  ;;  %v198_v61 = vld [vmem:[%s196_s26] ss:$0 sm:$0xff]  ;;  %s202_s28 = scalar_lea.vmem [#allocation7], %s869_s23 }
  0x23   : > { %vm110_vm2 = vmand %vm106_vm0, %vm616_vm1  ;;  %v204_v1 = vld [vmem:[%s202_s28] ss:$0 sm:$0xff]  ;;  %s97_s23 = sadd.s32 1, %s869_s23  }
  0x24   : > { %v111_v18 = vsel %vm110_vm2, %v911_v6, %v923_v14  ;;  %v112_v19 = vsel %vm110_vm2, %v103_v13, -inf  ;;  %p94_p3 = scmp.ge.s32.totalorder %s97_s23, 32  }
  0x25   : > { %vm121_vm4 = vcmp.lt.f32.partialorder %v112_v19, %v115_v15  ;;  %s871_s5 = smov (%p94_p3), %s1065_s1   ;;  %s875_s6 = smov (%p94_p3), [#allocation1]  }
  0x26   : > { %vm122_vm5 = vmand %vm118_vm3, %vm121_vm4  ;;  %vm950_vm3 = vcmp.eq.s32.totalorder %v946_v58, %v923_v14 }
  0x27   : > { %v123_v23 = vsel %vm122_vm5, %v920_v12, %v111_v18  ;;  %v124_v24 = vsel %vm122_vm5, %v115_v15, %v112_v19  ;;  %vm306_vm5 = vcmp.gt.s32.totalorder %v935_v22, %v923_v14 }
  0x28   : > { %vm133_vm7 = vcmp.lt.f32.partialorder %v124_v24, %v127_v20 }
  0x29   : > { %vm134_vm8 = vmand %vm130_vm6, %vm133_vm7  ;;  %vm250_vm6 = vcmp.gt.s32.totalorder %v920_v12, %v923_v14  ;;  %vm222_vm7 = vcmp.gt.s32.totalorder %v911_v6, %v923_v14 }
  0x2a   : > { %v135_v26 = vsel %vm134_vm8, %v928_v17, %v123_v23  ;;  %v136_v27 = vsel %vm134_vm8, %v127_v20, %v124_v24 }
  0x2b   : > { %vm145_vm10 = vcmp.lt.f32.partialorder %v136_v27, %v139_v25 }
  0x2c   : > { %vm146_vm11 = vmand %vm142_vm9, %vm145_vm10  ;;  %vm1068_vm9 = vcmp.gt.s32.totalorder %v928_v17, %v923_v14 }
  0x2d   : > { %v147_v28 = vsel %vm146_vm11, %v935_v22, %v135_v26  ;;  %v148_v29 = vsel %vm146_vm11, %v139_v25, %v136_v27 }
  0x2e   : > { %v149_v30 = vrot.slane %v148_v29, 1  ;;  %v150_v31 = vrot.slane %v147_v28, 1 }
  0x30   : > { %vm151_vm12 = vcmp.ge.f32.partialorder %v149_v30, %v148_v29  ;;  %v154_v32 = vrot.slane %v149_v30, 1  ;;  %v155_v33 = vrot.slane %v150_v31, 1 }
  0x31   : > { %v152_v34 = vsel %vm151_vm12, %v149_v30, %v148_v29  ;;  %v153_v35 = vsel %vm151_vm12, %v150_v31, %v147_v28 }
  0x32   : > { %vm156_vm13 = vcmp.ge.f32.partialorder %v154_v32, %v152_v34  ;;  %v159_v36 = vrot.slane %v154_v32, 1  ;;  %v160_v37 = vrot.slane %v155_v33, 1 }
  0x33   : > { %v157_v38 = vsel %vm156_vm13, %v154_v32, %v152_v34  ;;  %v158_v39 = vsel %vm156_vm13, %v155_v33, %v153_v35 }
  0x34   : > { %vm161_vm14 = vcmp.ge.f32.partialorder %v159_v36, %v157_v38  ;;  %v164_v40 = vrot.slane %v159_v36, 1  ;;  %v165_v41 = vrot.slane %v160_v37, 1 }
  0x35   : > { %v162_v42 = vsel %vm161_vm14, %v159_v36, %v157_v38  ;;  %v163_v43 = vsel %vm161_vm14, %v160_v37, %v158_v39 }
  0x36   : > { %vm166_vm15 = vcmp.ge.f32.partialorder %v164_v40, %v162_v42  ;;  %v169_v44 = vrot.slane %v164_v40, 1  ;;  %v170_v45 = vrot.slane %v165_v41, 1 }
  0x37   : > { %v167_v46 = vsel %vm166_vm15, %v164_v40, %v162_v42  ;;  %v168_v47 = vsel %vm166_vm15, %v165_v41, %v163_v43 }
  0x38   : > { %vm171_vm0 = vcmp.ge.f32.partialorder %v169_v44, %v167_v46  ;;  %v174_v48 = vrot.slane %v169_v44, 1  ;;  %v175_v49 = vrot.slane %v170_v45, 1 }
  0x39   : > { %v172_v50 = vsel %vm171_vm0, %v169_v44, %v167_v46  ;;  %v173_v51 = vsel %vm171_vm0, %v170_v45, %v168_v47  ;;  %vm1002_vm0 = vmand %vm306_vm5, %vm950_vm3 }
  0x3a   : > { %vm176_vm1 = vcmp.ge.f32.partialorder %v174_v48, %v172_v50  ;;  %v179_v52 = vrot.slane %v174_v48, 1  ;;  %v180_v53 = vrot.slane %v175_v49, 1 }
  0x3b   : > { %v177_v54 = vsel %vm176_vm1, %v174_v48, %v172_v50  ;;  %v178_v55 = vsel %vm176_vm1, %v175_v49, %v173_v51 }
  0x3c   : > { %vm181_vm2 = vcmp.ge.f32.partialorder %v179_v52, %v177_v54 }
  0x3d   : > { %v183_v56 = vsel %vm181_vm2, %v180_v53, %v178_v55  ;;  %vm1011_vm2 = vmand %vm250_vm6, %vm950_vm3 }
  0x3e   : > { %185 = vrot.lane.b32.xlu0 %v183_v56, %s184_s24 }
  0xb0   : > { %v186_v57 = vpop.permute.xlu0 %185 }
  0xb1   : > { %624 = vpush %v186_v57 }
  0xe2   : > { %s625_s25 = spop %624 }
  0xe3   : > { %v192_v62 = vstv %s625_s25  ;;  %s197_s27 = scalar_lea.vmem [#allocation1], %s625_s25  ;;  %s203_s29 = scalar_lea.vmem [#allocation7], %s625_s25 }
  0xe4   : > { %v194_v63 = vsel %vm950_vm3, %v192_v62, %v193_v60  ;;  %v957_v0 = vld [vmem:[%s197_s27] ss:$0 sm:$0xff] }
  0xe5   : > { %195 = vst [vmem:[#allocation2] sm:$0x1] %v194_v63  ;;  %v205_v2 = vld [vmem:[%s203_s29] ss:$0 sm:$0xff]  ;;  %vm208_vm4 = vcmp.ne.f32.partialorder %v957_v0, 0.0 }
  0xe6   : > { %200 = vst [vmem:[%s197_s27] sm:$0x1] %v198_v61  ;;  %vm209_vm8 = vmand %vm950_vm3, %vm208_vm4 }
  0xe7   : > { %201 = vst [vmem:[%s196_s26] sm:$0x1] %v957_v0  ;;  %v210_v3 = vsel %vm209_vm8, %v957_v0, 1.0 }
  0xe8   : > { %206 = vst [vmem:[%s203_s29] sm:$0x1] %v204_v1  ;;  %v307_v5 = vsel %vm306_vm5, %v210_v3, 1.0  ;;  %v251_v7 = vsel %vm250_vm6, %v210_v3, 1.0  ;;  %v223_v8 = vsel %vm222_vm7, %v210_v3, 1.0  ;;  %v985_v9 = vsel %vm1068_vm9, %v210_v3, 1.0 }
  0xe9   : > { %207 = vst [vmem:[%s202_s28] sm:$0x1] %v205_v2  ;;  %757 = vrcp.f32 %v307_v5  ;;  %v317_v10 = vand.u32 2147483647, %v307_v5  ;;  %v319_v11 = vand.u32 2147483648, %v307_v5  ;;  %v261_v15 = vand.u32 2147483647, %v251_v7 }
  0xea   : > { %759 = vrcp.f32 %v251_v7  ;;  %v263_v16 = vand.u32 2147483648, %v251_v7  ;;  %vm313_vm10 = vweird.f32 %v307_v5  ;;  %vm257_vm11 = vweird.f32 %v251_v7 }
  0xeb   : > { %761 = vrcp.f32 %v223_v8  ;;  %vm988_vm12 = vcmp.eq.f32.partialorder %v317_v10, 8.507059e+37  ;;  %v320_v25 = vor.u32 1.1754944e-38, %v319_v11  ;;  %vm992_vm13 = vcmp.eq.f32.partialorder %v261_v15, 8.507059e+37 }
  0xec   : > { %763 = vrcp.f32 %v985_v9  ;;  %v264_v30 = vor.u32 1.1754944e-38, %v263_v16  ;;  %vm229_vm14 = vweird.f32 %v223_v8  ;;  %v233_v36 = vand.u32 2147483647, %v223_v8 }
  0xed   : > { %v235_v37 = vand.u32 2147483648, %v223_v8  ;;  %vm285_vm8 = vweird.f32 %v985_v9  ;;  %v289_v42 = vand.u32 2147483647, %v985_v9  ;;  %v291_v43 = vand.u32 2147483648, %v985_v9 }
  0xee   : > { %v303_v46 = vld [vmem:[#allocation1 + $0x18] sm:$0xff]  ;;  %v247_v51 = vld [vmem:[#allocation1 + $0x8] sm:$0xff]  ;;  %v219_v57 = vld [vmem:[#allocation1] sm:$0xff] }
  0xef   : > { %v758_v13 = vpop.eup %757  ;;  %v236_v49 = vor.u32 1.1754944e-38, %v235_v37  ;;  %v292_v1 = vor.u32 1.1754944e-38, %v291_v43 }
  0xf0   : > { %v760_v18 = vpop.eup %759  ;;  %v309_v19 = vmul.f32 %v758_v13, %v307_v5  ;;  %vm314_vm15 = vweird.f32 %v758_v13 }
  0xf1   : > { %v762_v20 = vpop.eup %761  ;;  %v253_v21 = vmul.f32 %v760_v18, %v251_v7  ;;  %vm258_vm1 = vweird.f32 %v760_v18  ;;  %vm315_vm5 = vmor %vm313_vm10, %vm314_vm15  ;;  %vm234_vm15 = vcmp.eq.f32.partialorder %v233_v36, 8.507059e+37  ;;  %v275_v7 = vld [vmem:[#allocation1 + $0x10] sm:$0xff] }
  0xf2   : > { %v310_v23 = vsub.f32 1.0, %v309_v19  ;;  %v225_v26 = vmul.f32 %v762_v20, %v223_v8  ;;  %v764_v27 = vpop.eup %763  ;;  %vm230_vm4 = vweird.f32 %v762_v20  ;;  %vm259_vm9 = vmor %vm257_vm11, %vm258_vm1 }
  0xf3   : > { %v254_v28 = vsub.f32 1.0, %v253_v21  ;;  %v281_v33 = vmul.f32 %v764_v27, %v985_v9  ;;  %vm286_vm6 = vweird.f32 %v764_v27  ;;  %vm231_vm10 = vmor %vm229_vm14, %vm230_vm4  ;;  %vm214_vm14 = vcmp.gt.s32.totalorder %v946_v58, %v923_v14  ;;  %v332_v58 = vld [vmem:[#allocation7 + $0x8] sm:$0xff] (%p94_p3) }
  0xf4   : > { %v311_v31 = vmul.f32 %v758_v13, %v310_v23  ;;  %v226_v32 = vsub.f32 1.0, %v225_v26  ;;  %vm1031_vm11 = vmand %vm222_vm7, %vm950_vm3  ;;  %vm290_vm7 = vcmp.eq.f32.partialorder %v289_v42, 8.507059e+37  ;;  %v215_v10 = vsel %vm214_vm14, %v957_v0, 0.0  ;;  %v334_v0 = vld [vmem:[#allocation7 + $0x10] sm:$0xff] (%p94_p3)  ;;  %v384_v26 = vld [vmem:[#allocation2] sm:$0x1] (%p94_p3) }
  0xf5   : > { %v255_v35 = vmul.f32 %v760_v18, %v254_v28  ;;  %v282_v22 = vsub.f32 1.0, %v281_v33  ;;  %387 = vst [vmem:[#allocation3] sm:$0x1] (%p94_p3), %v384_v26 }
  0xf6   : > { %v312_v38 = vadd.f32 %v758_v13, %v311_v31  ;;  %v227_v40 = vmul.f32 %v762_v20, %v226_v32 }
  0xf7   : > { %v256_v41 = vadd.f32 %v760_v18, %v255_v35  ;;  %v283_v45 = vmul.f32 %v764_v27, %v282_v22 }
  0xf8   : > { %v316_v44 = vsel %vm315_vm5, %v758_v13, %v312_v38  ;;  %v228_v12 = vadd.f32 %v762_v20, %v227_v40 }
  0xf9   : > { %v321_v47 = vsel %vm988_vm12, %v320_v25, %v316_v44  ;;  %v260_v48 = vsel %vm259_vm9, %v760_v18, %v256_v41  ;;  %v284_v55 = vadd.f32 %v764_v27, %v283_v45  ;;  %vm287_vm9 = vmor %vm285_vm8, %vm286_vm6  ;;  %vm1081_vm12 = vcmp.gt.s32.totalorder %v928_v17, %v923_v14  ;;  %v330_v14 = vld [vmem:[#allocation7] sm:$0xff] (%p94_p3)  ;;  %v336_v25 = vld [vmem:[#allocation7 + $0x18] sm:$0xff] (%p94_p3) }
  0xfa   : > { %v322_v50 = vmul.f32 %v321_v47, %v303_v46  ;;  %v265_v52 = vsel %vm992_vm13, %v264_v30, %v260_v48  ;;  %v232_v53 = vsel %vm231_vm10, %v762_v20, %v228_v12  ;;  %vm295_vm13 = vmand %vm1081_vm12, %vm950_vm3 }
  0xfb   : > { %v266_v56 = vmul.f32 %v265_v52, %v247_v51  ;;  %v237_v60 = vsel %vm234_vm15, %v236_v49, %v232_v53  ;;  %v288_v63 = vsel %vm287_vm9, %v764_v27, %v284_v55 }
  0xfc   : > { %v324_v61 = vsel %vm1002_vm0, %v322_v50, 0.0  ;;  %v238_v62 = vmul.f32 %v237_v60, %v219_v57  ;;  %v293_v5 = vsel %vm290_vm7, %v292_v1, %v288_v63 }
  0xfd   : > { %325 = vadd.xlane.f32.xlu2 %v324_v61  ;;  %v268_v2 = vsel %vm1011_vm2, %v266_v56, 0.0  ;;  %v294_v8 = vmul.f32 %v293_v5, %v275_v7 }
  0xfe   : > { %269 = vadd.xlane.f32.xlu1 %v268_v2  ;;  %v240_v3 = vsel %vm1031_vm11, %v238_v62, 0.0 }
  0xff   : > { %241 = vadd.xlane.f32.xlu0 %v240_v3  ;;  %v296_v9 = vsel %vm295_vm13, %v294_v8, 0.0 }
 0x106   : > { %297 = vadd.xlane.f32.xlu1 %v296_v9 }
 0x128   :  { %349 = vxpose.xlu0.b32.start [1/4] (short) (narrow) (%p94_p3), %v330_v14, 8 }
 0x130   :  { %350 = vxpose.xlu0.b32.cont [2/4] (short) (narrow) (%p94_p3), %v332_v58, 8 }
 0x138   :  { %351 = vxpose.xlu0.b32.cont [3/4] (short) (narrow) (%p94_p3), %v334_v0, 8 }
 0x140   :  { %352 = vxpose.xlu0.b32.end [4/4] (short) (narrow) (%p94_p3), %v336_v25, 8 }
 0x170   : > { %v326_v11 = vpop.xlane.xlu2 %325 }
 0x171   : > { %v327_v13 = vmul.f32 %v326_v11, %v215_v10  ;;  %v270_v15 = vpop.xlane.xlu1 %269 }
 0x172   : > { %v271_v16 = vmul.f32 %v270_v15, %v215_v10  ;;  %v242_v18 = vpop.xlane.xlu0 %241 }
 0x173   : > { %v328_v19 = vsub.f32 %v322_v50, %v327_v13  ;;  %v243_v20 = vmul.f32 %v242_v18, %v215_v10 }
 0x174   : > { %v272_v21 = vsub.f32 %v266_v56, %v271_v16 }
 0x175   : > { %329 = vst [vmem:[#allocation1 + $0x18] sm:$0xff] %v328_v19  ;;  %v244_v59 = vsub.f32 %v238_v62, %v243_v20 }
 0x176   : > { %273 = vst [vmem:[#allocation1 + $0x8] sm:$0xff] %v272_v21 }
 0x177   : > { %245 = vst [vmem:[#allocation1] sm:$0xff] %v244_v59 }
 0x179   : > { %v298_v17 = vpop.xlane.xlu1 %297 }
 0x17a   : > { %v299_v23 = vmul.f32 %v298_v17, %v215_v10 }
 0x17c   : > { %v300_v24 = vsub.f32 %v294_v8, %v299_v23  ;;  %96 = sbr.rel (!%p94_p3) target bundleno = 31 (0x1f), region = 193 }
 0x17e   : > { %301 = vst [vmem:[#allocation1 + $0x10] sm:$0xff] %v300_v24 }
 0x1cc   :  { %v365_v27 = vpop.trf.xlu0 }
 0x1cd   :  { %381 = vst [vmem:[#allocation5] sm:$0x1] %v365_v27 }
 0x1d4   :  { %v390_v28 = vld [vmem:[#allocation5] sm:$0x1] }
 0x1d5   :  { %393 = vst [vmem:[#allocation6] sm:$0x1] %v390_v28 }
 0x1d6 LB: > { %v437_v4 = vld [vmem:[%s877_s6] sm:$0xff]  ;;  %s439_s6 = scalar_lea.vmem %s877_s6, 8   ;;  %s877_s6 = sphi %s875_s6, %s439_s6   ;;  %s873_s5 = sphi %s871_s5, %s440_s5  }
 0x1d7   : > { %438 = vst [vmem:[%s873_s5] sm:$0xff] %v437_v4  ;;  %s440_s5 = scalar_lea.vmem %s873_s5, 8   ;;  %p434_p4 = scmp.gt.s32.totalorder %s439_s6, [#allocation1 + $0x18] }
 0x1d8   :  { %s457_s9 = sshll.u32 (%p434_p4), %s1066_s2, 4  ;;  %s880_s10 = smov (%p434_p4), [#allocation3]   ;;  %s458_s9 = int_to_ptr.hbm [resolvable:$true] %s457_s9 }
 0x1d9   :  { %436 = sbr.rel (!%p434_p4) target bundleno = 470 (0x1d6), region = 215  ;;  %s455_s1 = sshll.u32 (%p434_p4), %s880_s10, 4  ;;  %s456_s1 = int_to_ptr.vmem [resolvable:$true] %s455_s1 }
 0x1da   :  { %460 = dma.vmem_to_hbm [thread:$0]  (%p434_p4), %s456_s1, 16, %s458_s9, [#allocation4]  }
 0x1dc   :  { %v517_v6 = vld [vmem:[#allocation6] sm:$0x1] (%p434_p4) }
 0x1dd   :  { %518 = vst [vmem:[%s1067_s3] sm:$0x1] (%p434_p4), %v517_v6 }
 0x1de   :  { %853 = dma.done.wait [#allocation4], 16  }
 0x1df   :  { %854 = vsyncadd [#allocation4], 4294967280 }
 0x1e0   :  { %525 = vsyncpa [#allocation4], 1 }

// kernel: custom-call.10
= control target key start
LH: loop header
LB: loop body
LE: loop exit
PB: predicated region body
PF: predicated region fallthrough
CT: control target
= control target key end

     0   :  { %v47_v0 = vlaneseq  ;;  %v836_v18 = vmov -1.0   ;;  %v837_v61 = vmov 0.0   ;;  %s1040_s0 = inlined_call_operand.vmem [shape: f32[1,32,32], index: 0, kind: input, shape index: {}]   ;;  %s1041_s1 = inlined_call_operand.vmem [shape: f32[1,32,32], index: 1, kind: output, shape index: {}]  }
   0x1   :  { %v36_v1 = vld [vmem:[%s1040_s0] sm:$0xff]  ;;  %v38_v39 = vld [vmem:[%s1040_s0 + $0x8] sm:$0xff] }
   0x2   :  { %v851_v2 = vand.u32 127, %v47_v0  ;;  %v853_v3 = vshrl.u32 %v47_v0, 7 }
   0x4   :  { %vm53_vm0 = vcmp.eq.s32.totalorder %v853_v3, %v851_v2  ;;  %vm49_vm1 = vcmp.lt.s32.totalorder %v851_v2, 32  ;;  %vm58_vm2 = vcmp.ge.s32.totalorder %v853_v3, %v851_v2  ;;  %vm172_vm8 = vcmp.eq.s32.totalorder %v851_v2, 0 }
   0x5   :  { %v55_v4 = vsel %vm53_vm0, %v36_v1, 0.0  ;;  %vm59_vm3 = vmand %vm58_vm2, %vm49_vm1  ;;  %vm169_vm9 = vcmp.eq.s32.totalorder %v851_v2, %v853_v3  ;;  %v173_v19 = vsel %vm172_vm8, 1.0, %v836_v18  ;;  %vm201_vm10 = vcmp.eq.s32.totalorder %v851_v2, 1 }
   0x6   :  { %56 = vadd.xlane.f32.xlu0 %v55_v4  ;;  %v60_v13 = vsel %vm59_vm3, %v36_v1, 0.0  ;;  %v174_v20 = vsel %vm169_vm9, %v173_v19, 0.0  ;;  %vm211_vm11 = vcmp.eq.s32.totalorder %v851_v2, 2  ;;  %vm221_vm12 = vcmp.eq.s32.totalorder %v851_v2, 3 }
   0x7   :  { %v81_v40 = vadd.s32 8, %v853_v3  ;;  %vm231_vm14 = vcmp.eq.s32.totalorder %v851_v2, 4  ;;  %vm241_vm8 = vcmp.eq.s32.totalorder %v851_v2, 5  ;;  %vm251_vm9 = vcmp.eq.s32.totalorder %v851_v2, 6 }
   0x9   :  { %vm82_vm13 = vcmp.eq.s32.totalorder %v81_v40, %v851_v2  ;;  %vm87_vm15 = vcmp.ge.s32.totalorder %v81_v40, %v851_v2 }
   0xa   :  { %v84_v41 = vsel %vm82_vm13, %v38_v39, 0.0  ;;  %vm88_vm3 = vmand %vm87_vm15, %vm49_vm1  ;;  %vm299_vm13 = vcmp.eq.s32.totalorder %v851_v2, 10  ;;  %vm327_vm15 = vcmp.eq.s32.totalorder %v851_v2, 12 }
   0xb   :  { %v89_v56 = vsel %vm88_vm3, %v38_v39, 0.0  ;;  %vm341_vm3 = vcmp.eq.s32.totalorder %v851_v2, 13 }
  0x79   :  { %v857_v5 = vpop.xlane.xlu0 %56 }
  0x7a   :  { %828 = vrcp.f32 %v857_v5  ;;  %v72_v9 = vand.u32 2147483648, %v857_v5  ;;  %v70_v11 = vand.u32 2147483647, %v857_v5  ;;  %vm66_vm5 = vweird.f32 %v857_v5 }
  0x7c   :  { %v73_v14 = vor.u32 1.1754944e-38, %v72_v9  ;;  %vm71_vm7 = vcmp.eq.f32.partialorder %v70_v11, 8.507059e+37 }
  0x80   :  { %v829_v6 = vpop.eup %828 }
  0x81   :  { %v62_v7 = vmul.f32 %v829_v6, %v857_v5  ;;  %vm67_vm4 = vweird.f32 %v829_v6 }
  0x82   :  { %vm68_vm6 = vmor %vm66_vm5, %vm67_vm4 }
  0x83   :  { %v63_v8 = vsub.f32 1.0, %v62_v7 }
  0x85   :  { %v64_v10 = vmul.f32 %v829_v6, %v63_v8 }
  0x87   :  { %v65_v12 = vadd.f32 %v829_v6, %v64_v10 }
  0x89   :  { %v69_v15 = vsel %vm68_vm6, %v829_v6, %v65_v12 }
  0x8a   :  { %v871_v16 = vsel %vm71_vm7, %v73_v14, %v69_v15  ;;  %vm180_vm7 = vcmp.eq.s32.totalorder %v851_v2, %v81_v40 }
  0x8b   :  { %v75_v17 = vmul.f32 %v871_v16, %v60_v13  ;;  %v181_v62 = vsel %vm180_vm7, -1.0, %v837_v61 }
  0x8d   :  { %76 = vst [vmem:[#allocation2] sm:$0xff] %v75_v17 }
  0x94   :  { %v197_v21 = vld [vmem:[#allocation2 + $0x1] ss:$0 sm:$0xff]  ;;  %v207_v24 = vld [vmem:[#allocation2 + $0x2] ss:$0 sm:$0xff]  ;;  %v217_v29 = vld [vmem:[#allocation2 + $0x3] ss:$0 sm:$0xff] }
  0x95   :  { %v198_v22 = vxor.u32 2147483648, %v197_v21  ;;  %v208_v26 = vxor.u32 2147483648, %v207_v24  ;;  %v218_v31 = vxor.u32 2147483648, %v217_v29  ;;  %v227_v34 = vld [vmem:[#allocation2 + $0x4] ss:$0 sm:$0xff] }
  0x96   :  { %v228_v36 = vxor.u32 2147483648, %v227_v34  ;;  %v237_v42 = vld [vmem:[#allocation2 + $0x5] ss:$0 sm:$0xff]  ;;  %v247_v60 = vld [vmem:[#allocation2 + $0x6] ss:$0 sm:$0xff] }
  0x97   :  { %v202_v23 = vmul.f32 %v198_v22, %v174_v20  ;;  %v238_v44 = vxor.u32 2147483648, %v237_v42  ;;  %v248_v1 = vxor.u32 2147483648, %v247_v60  ;;  %v257_v9 = vld [vmem:[#allocation2 + $0x7] ss:$0 sm:$0xff] }
  0x98   :  { %v258_v11 = vxor.u32 2147483648, %v257_v9 }
  0x99   :  { %203 = vadd.xlane.f32.xlu0 %v202_v23 }
 0x10c   :  { %v204_v25 = vpop.xlane.xlu0 %203 }
 0x10d   :  { %v205_v27 = vsel %vm201_vm10, %v204_v25, %v174_v20  ;;  %vm261_vm10 = vcmp.eq.s32.totalorder %v851_v2, 7 }
 0x10e   :  { %v212_v28 = vmul.f32 %v208_v26, %v205_v27 }
 0x110   :  { %213 = vadd.xlane.f32.xlu1 %v212_v28 }
 0x183   :  { %v214_v30 = vpop.xlane.xlu1 %213 }
 0x184   :  { %v215_v32 = vsel %vm211_vm11, %v214_v30, %v205_v27  ;;  %vm271_vm11 = vcmp.eq.s32.totalorder %v851_v2, 8 }
 0x185   :  { %v222_v33 = vmul.f32 %v218_v31, %v215_v32 }
 0x187   :  { %223 = vadd.xlane.f32.xlu1 %v222_v33 }
 0x18f   :  { %85 = vadd.xlane.f32.xlu1 %v84_v41 }
 0x1fa   :  { %v224_v35 = vpop.xlane.xlu1 %223 }
 0x1fb   :  { %v225_v37 = vsel %vm221_vm12, %v224_v35, %v215_v32  ;;  %vm285_vm12 = vcmp.eq.s32.totalorder %v851_v2, 9 }
 0x1fc   :  { %v232_v38 = vmul.f32 %v228_v36, %v225_v37 }
 0x1fe   :  { %233 = vadd.xlane.f32.xlu2 %v232_v38 }
 0x202   :  { %v886_v47 = vpop.xlane.xlu1 %85 }
 0x203   :  { %830 = vrcp.f32 %v886_v47  ;;  %v101_v50 = vand.u32 2147483648, %v886_v47  ;;  %vm95_vm0 = vweird.f32 %v886_v47  ;;  %v99_v52 = vand.u32 2147483647, %v886_v47 }
 0x205   :  { %v102_v54 = vor.u32 1.1754944e-38, %v101_v50  ;;  %vm100_vm6 = vcmp.eq.f32.partialorder %v99_v52, 8.507059e+37 }
 0x209   :  { %v831_v48 = vpop.eup %830 }
 0x20a   :  { %v91_v49 = vmul.f32 %v831_v48, %v886_v47  ;;  %vm96_vm2 = vweird.f32 %v831_v48 }
 0x20b   :  { %vm97_vm4 = vmor %vm95_vm0, %vm96_vm2 }
 0x20c   :  { %v92_v51 = vsub.f32 1.0, %v91_v49 }
 0x20e   :  { %v93_v53 = vmul.f32 %v831_v48, %v92_v51 }
 0x210   :  { %v94_v55 = vadd.f32 %v831_v48, %v93_v53 }
 0x212   :  { %v98_v57 = vsel %vm97_vm4, %v831_v48, %v94_v55 }
 0x213   :  { %v898_v58 = vsel %vm100_vm6, %v102_v54, %v98_v57  ;;  %v40_v57 = vld [vmem:[%s1040_s0 + $0x10] sm:$0xff] }
 0x214   :  { %v104_v59 = vmul.f32 %v898_v58, %v89_v56  ;;  %v110_v56 = vadd.s32 16, %v853_v3 }
 0x216   :  { %105 = vst [vmem:[#allocation2 + $0x8] sm:$0xff] %v104_v59  ;;  %vm111_vm2 = vcmp.eq.s32.totalorder %v110_v56, %v851_v2  ;;  %vm116_vm4 = vcmp.ge.s32.totalorder %v110_v56, %v851_v2 }
 0x217   :  { %v113_v59 = vsel %vm111_vm2, %v40_v57, 0.0  ;;  %vm419_vm2 = vcmp.eq.s32.totalorder %v851_v2, 18 }
 0x21d   :  { %v267_v63 = vld [vmem:[#allocation2 + $0x8] ss:$0 sm:$0xff]  ;;  %v281_v18 = vld [vmem:[#allocation2 + $0x9] ss:$0 sm:$0xff]  ;;  %v295_v26 = vld [vmem:[#allocation2 + $0xa] ss:$0 sm:$0xff] }
 0x21e   :  { %v268_v4 = vxor.u32 2147483648, %v267_v63  ;;  %v282_v20 = vxor.u32 2147483648, %v281_v18  ;;  %v296_v28 = vxor.u32 2147483648, %v295_v26  ;;  %v309_v34 = vld [vmem:[#allocation2 + $0xb] ss:$0 sm:$0xff] }
 0x21f   :  { %v310_v36 = vxor.u32 2147483648, %v309_v34  ;;  %v323_v42 = vld [vmem:[#allocation2 + $0xc] ss:$0 sm:$0xff]  ;;  %v337_v51 = vld [vmem:[#allocation2 + $0xd] ss:$0 sm:$0xff] }
 0x220   :  { %v276_v8 = vmul.f32 %v268_v4, %v181_v62  ;;  %v338_v53 = vxor.u32 2147483648, %v337_v51 }
 0x222   :  { %277 = vadd.xlane.f32.xlu1 %v276_v8 }
 0x271   :  { %v234_v43 = vpop.xlane.xlu2 %233 }
 0x272   :  { %v235_v45 = vsel %vm231_vm14, %v234_v43, %v225_v37  ;;  %vm313_vm14 = vcmp.eq.s32.totalorder %v851_v2, 11 }
 0x273   :  { %v242_v46 = vmul.f32 %v238_v44, %v235_v45  ;;  %v324_v44 = vxor.u32 2147483648, %v323_v42 }
 0x275   :  { %243 = vadd.xlane.f32.xlu2 %v242_v46 }
 0x295   :  { %v278_v19 = vpop.xlane.xlu1 %277 }
 0x296   :  { %v279_v21 = vsel %vm271_vm11, %v278_v19, %v181_v62 }
 0x297   :  { %v290_v22 = vmul.f32 %v282_v20, %v279_v21 }
 0x2e8   :  { %v244_v0 = vpop.xlane.xlu2 %243 }
 0x2e9   :  { %v245_v6 = vsel %vm241_vm8, %v244_v0, %v235_v45  ;;  %v351_v0 = vld [vmem:[#allocation2 + $0xe] ss:$0 sm:$0xff]  ;;  %vm117_vm8 = vmand %vm116_vm4, %vm49_vm1  ;;  %vm455_vm4 = vcmp.eq.s32.totalorder %v851_v2, 20 }
 0x2ea   :  { %v252_v7 = vmul.f32 %v248_v1, %v245_v6  ;;  %v118_v18 = vsel %vm117_vm8, %v40_v57, 0.0 }
 0x2ec   :  { %253 = vadd.xlane.f32.xlu0 %v252_v7 }
 0x35f   :  { %v254_v10 = vpop.xlane.xlu0 %253 }
 0x360   :  { %v255_v12 = vsel %vm251_vm9, %v254_v10, %v245_v6 }
 0x361   :  { %v262_v13 = vmul.f32 %v258_v11, %v255_v12 }
 0x363   :  { %263 = vadd.xlane.f32.xlu2 %v262_v13 }
 0x3d6   :  { %v264_v14 = vpop.xlane.xlu2 %263 }
 0x3d7   :  { %v265_v15 = vsel %vm261_vm10, %v264_v14, %v255_v12 }
 0x3d8   :  { %v272_v17 = vmul.f32 %v268_v4, %v265_v15  ;;  %v352_v4 = vxor.u32 2147483648, %v351_v0 }
 0x3da   :  { %273 = vadd.xlane.f32.xlu0 %v272_v17 }
 0x3e2   :  { %291 = vadd.xlane.f32.xlu0 %v290_v22 }
 0x44d   :  { %v274_v23 = vpop.xlane.xlu0 %273 }
 0x44e   :  { %v275_v24 = vsel %vm271_vm11, %v274_v23, %v265_v15  ;;  %vm355_vm11 = vcmp.eq.s32.totalorder %v851_v2, 14 }
 0x44f   :  { %v286_v25 = vmul.f32 %v282_v20, %v275_v24 }
 0x451   :  { %287 = vadd.xlane.f32.xlu2 %v286_v25  ;;  %v365_v25 = vld [vmem:[#allocation2 + $0xf] ss:$0 sm:$0xff] }
 0x455   :  { %v292_v27 = vpop.xlane.xlu0 %291 }
 0x456   :  { %v293_v29 = vsel %vm285_vm12, %v292_v27, %v279_v21  ;;  %v366_v27 = vxor.u32 2147483648, %v365_v25 }
 0x457   :  { %v304_v30 = vmul.f32 %v296_v28, %v293_v29 }
 0x459   :  { %305 = vadd.xlane.f32.xlu2 %v304_v30 }
 0x4c4   :  { %v288_v31 = vpop.xlane.xlu2 %287 }
 0x4c5   :  { %v289_v32 = vsel %vm285_vm12, %v288_v31, %v275_v24  ;;  %vm187_vm12 = vcmp.eq.s32.totalorder %v851_v2, %v110_v56 }
 0x4c6   :  { %v300_v33 = vmul.f32 %v296_v28, %v289_v32 }
 0x4c8   :  { %301 = vadd.xlane.f32.xlu1 %v300_v33 }
 0x4cc   :  { %v306_v35 = vpop.xlane.xlu2 %305 }
 0x4cd   :  { %v307_v37 = vsel %vm299_vm13, %v306_v35, %v293_v29 }
 0x4ce   :  { %v318_v38 = vmul.f32 %v310_v36, %v307_v37 }
 0x4d0   :  { %319 = vadd.xlane.f32.xlu1 %v318_v38 }
 0x53b   :  { %v302_v39 = vpop.xlane.xlu1 %301 }
 0x53c   :  { %v303_v40 = vsel %vm299_vm13, %v302_v39, %v289_v32  ;;  %v188_v32 = vsel %vm187_vm12, -1.0, %v837_v61  ;;  %vm369_vm13 = vcmp.eq.s32.totalorder %v851_v2, 15 }
 0x53d   :  { %v314_v41 = vmul.f32 %v310_v36, %v303_v40 }
 0x53f   :  { %315 = vadd.xlane.f32.xlu0 %v314_v41 }
 0x543   :  { %v320_v43 = vpop.xlane.xlu1 %319 }
 0x544   :  { %v321_v45 = vsel %vm313_vm14, %v320_v43, %v307_v37 }
 0x545   :  { %v332_v46 = vmul.f32 %v324_v44, %v321_v45 }
 0x547   :  { %333 = vadd.xlane.f32.xlu0 %v332_v46 }
 0x5b2   :  { %v316_v48 = vpop.xlane.xlu0 %315 }
 0x5b3   :  { %v317_v49 = vsel %vm313_vm14, %v316_v48, %v303_v40  ;;  %vm383_vm14 = vcmp.eq.s32.totalorder %v851_v2, 16 }
 0x5b4   :  { %v328_v50 = vmul.f32 %v324_v44, %v317_v49 }
 0x5b6   :  { %329 = vadd.xlane.f32.xlu2 %v328_v50 }
 0x5ba   :  { %v334_v52 = vpop.xlane.xlu0 %333 }
 0x5bb   :  { %v335_v54 = vsel %vm327_vm15, %v334_v52, %v321_v45 }
 0x5bc   :  { %v346_v55 = vmul.f32 %v338_v53, %v335_v54 }
 0x5be   :  { %347 = vadd.xlane.f32.xlu2 %v346_v55 }
 0x5c6   :  { %114 = vadd.xlane.f32.xlu2 %v113_v59 }
 0x629   :  { %v330_v60 = vpop.xlane.xlu2 %329 }
 0x62a   :  { %v331_v62 = vsel %vm327_vm15, %v330_v60, %v317_v49  ;;  %vm401_vm15 = vcmp.eq.s32.totalorder %v851_v2, 17 }
 0x62b   :  { %v342_v63 = vmul.f32 %v338_v53, %v331_v62 }
 0x62d   :  { %343 = vadd.xlane.f32.xlu1 %v342_v63 }
 0x631   :  { %v348_v1 = vpop.xlane.xlu2 %347 }
 0x632   :  { %v349_v6 = vsel %vm341_vm3, %v348_v1, %v335_v54 }
 0x633   :  { %v360_v7 = vmul.f32 %v352_v4, %v349_v6 }
 0x635   :  { %361 = vadd.xlane.f32.xlu1 %v360_v7 }
 0x639   :  { %v919_v8 = vpop.xlane.xlu2 %114 }
 0x63a   :  { %832 = vrcp.f32 %v919_v8  ;;  %v130_v11 = vand.u32 2147483648, %v919_v8  ;;  %vm124_vm6 = vweird.f32 %v919_v8  ;;  %v128_v13 = vand.u32 2147483647, %v919_v8 }
 0x63c   :  { %v131_v15 = vor.u32 1.1754944e-38, %v130_v11  ;;  %vm129_vm10 = vcmp.eq.f32.partialorder %v128_v13, 8.507059e+37 }
 0x640   :  { %v833_v9 = vpop.eup %832 }
 0x641   :  { %v120_v10 = vmul.f32 %v833_v9, %v919_v8  ;;  %vm125_vm7 = vweird.f32 %v833_v9 }
 0x642   :  { %vm126_vm9 = vmor %vm124_vm6, %vm125_vm7  ;;  %vm473_vm7 = vcmp.eq.s32.totalorder %v851_v2, 21 }
 0x643   :  { %v121_v12 = vsub.f32 1.0, %v120_v10 }
 0x645   :  { %v122_v14 = vmul.f32 %v833_v9, %v121_v12 }
 0x647   :  { %v123_v17 = vadd.f32 %v833_v9, %v122_v14 }
 0x649   :  { %v127_v19 = vsel %vm126_vm9, %v833_v9, %v123_v17  ;;  %vm491_vm9 = vcmp.eq.s32.totalorder %v851_v2, 22 }
 0x64a   :  { %v931_v20 = vsel %vm129_vm10, %v131_v15, %v127_v19 }
 0x64b   :  { %v133_v21 = vmul.f32 %v931_v20, %v118_v18 }
 0x64d   :  { %134 = vst [vmem:[#allocation2 + $0x10] sm:$0xff] %v133_v21 }
 0x654   :  { %v379_v29 = vld [vmem:[#allocation2 + $0x10] ss:$0 sm:$0xff]  ;;  %v397_v40 = vld [vmem:[#allocation2 + $0x11] ss:$0 sm:$0xff]  ;;  %v415_v52 = vld [vmem:[#allocation2 + $0x12] ss:$0 sm:$0xff] }
 0x655   :  { %v380_v31 = vxor.u32 2147483648, %v379_v29  ;;  %v398_v41 = vxor.u32 2147483648, %v397_v40  ;;  %v416_v54 = vxor.u32 2147483648, %v415_v52  ;;  %v433_v1 = vld [vmem:[#allocation2 + $0x13] ss:$0 sm:$0xff] }
 0x656   :  { %v451_v17 = vld [vmem:[#allocation2 + $0x14] ss:$0 sm:$0xff]  ;;  %v469_v29 = vld [vmem:[#allocation2 + $0x15] ss:$0 sm:$0xff]  ;;  %v487_v40 = vld [vmem:[#allocation2 + $0x16] ss:$0 sm:$0xff] }
 0x657   :  { %v392_v33 = vmul.f32 %v380_v31, %v188_v32  ;;  %v452_v19 = vxor.u32 2147483648, %v451_v17 }
 0x6a0   :  { %v344_v22 = vpop.xlane.xlu1 %343 }
 0x6a1   :  { %v345_v23 = vsel %vm341_vm3, %v344_v22, %v331_v62  ;;  %vm437_vm3 = vcmp.eq.s32.totalorder %v851_v2, 19 }
 0x6a2   :  { %v356_v24 = vmul.f32 %v352_v4, %v345_v23 }
 0x6a4   :  { %357 = vadd.xlane.f32.xlu0 %v356_v24 }
 0x6a8   :  { %v362_v26 = vpop.xlane.xlu1 %361 }
 0x6a9   :  { %v363_v28 = vsel %vm355_vm11, %v362_v26, %v349_v6  ;;  %v434_v6 = vxor.u32 2147483648, %v433_v1 }
 0x6aa   :  { %v374_v30 = vmul.f32 %v366_v27, %v363_v28 }
 0x6ac   :  { %375 = vadd.xlane.f32.xlu1 %v374_v30 }
 0x6b4   :  { %393 = vadd.xlane.f32.xlu1 %v392_v33 }
 0x717   :  { %v358_v34 = vpop.xlane.xlu0 %357 }
 0x718   :  { %v359_v35 = vsel %vm355_vm11, %v358_v34, %v345_v23 }
 0x719   :  { %v370_v36 = vmul.f32 %v366_v27, %v359_v35 }
 0x71b   :  { %371 = vadd.xlane.f32.xlu0 %v370_v36 }
 0x71f   :  { %v376_v37 = vpop.xlane.xlu1 %375 }
 0x720   :  { %v377_v38 = vsel %vm369_vm13, %v376_v37, %v363_v28 }
 0x721   :  { %v388_v39 = vmul.f32 %v380_v31, %v377_v38 }
 0x723   :  { %389 = vadd.xlane.f32.xlu0 %v388_v39 }
 0x727   :  { %v394_v42 = vpop.xlane.xlu1 %393 }
 0x728   :  { %v395_v43 = vsel %vm383_vm14, %v394_v42, %v188_v32  ;;  %v488_v42 = vxor.u32 2147483648, %v487_v40 }
 0x729   :  { %v410_v44 = vmul.f32 %v398_v41, %v395_v43 }
 0x72b   :  { %411 = vadd.xlane.f32.xlu1 %v410_v44 }
 0x78e   :  { %v372_v45 = vpop.xlane.xlu0 %371 }
 0x78f   :  { %v373_v46 = vsel %vm369_vm13, %v372_v45, %v359_v35 }
 0x790   :  { %v384_v48 = vmul.f32 %v380_v31, %v373_v46  ;;  %v470_v31 = vxor.u32 2147483648, %v469_v29 }
 0x792   :  { %385 = vadd.xlane.f32.xlu2 %v384_v48 }
 0x796   :  { %v390_v49 = vpop.xlane.xlu0 %389 }
 0x797   :  { %v391_v50 = vsel %vm383_vm14, %v390_v49, %v377_v38 }
 0x798   :  { %v406_v51 = vmul.f32 %v398_v41, %v391_v50 }
 0x79a   :  { %407 = vadd.xlane.f32.xlu0 %v406_v51 }
 0x79e   :  { %v412_v53 = vpop.xlane.xlu1 %411 }
 0x79f   :  { %v413_v55 = vsel %vm401_vm15, %v412_v53, %v395_v43 }
 0x7a0   :  { %v428_v56 = vmul.f32 %v416_v54, %v413_v55 }
 0x7a2   :  { %429 = vadd.xlane.f32.xlu1 %v428_v56  ;;  %v505_v56 = vld [vmem:[#allocation2 + $0x17] ss:$0 sm:$0xff] }
 0x805   :  { %v386_v57 = vpop.xlane.xlu2 %385 }
 0x806   :  { %v387_v59 = vsel %vm383_vm14, %v386_v57, %v373_v46  ;;  %v42_v57 = vld [vmem:[%s1040_s0 + $0x18] sm:$0xff] }
 0x807   :  { %v402_v60 = vmul.f32 %v398_v41, %v387_v59 }
 0x809   :  { %403 = vadd.xlane.f32.xlu2 %v402_v60  ;;  %v506_v60 = vxor.u32 2147483648, %v505_v56 }
 0x80d   :  { %v408_v62 = vpop.xlane.xlu0 %407 }
 0x80e   :  { %v409_v63 = vsel %vm401_vm15, %v408_v62, %v391_v50 }
 0x80f   :  { %v424_v0 = vmul.f32 %v416_v54, %v409_v63 }
 0x811   :  { %425 = vadd.xlane.f32.xlu0 %v424_v0 }
 0x815   :  { %v430_v4 = vpop.xlane.xlu1 %429 }
 0x816   :  { %v431_v7 = vsel %vm419_vm2, %v430_v4, %v413_v55  ;;  %v139_v55 = vadd.s32 24, %v853_v3 }
 0x817   :  { %v446_v9 = vmul.f32 %v434_v6, %v431_v7 }
 0x818   :  { %vm140_vm8 = vcmp.eq.s32.totalorder %v139_v55, %v851_v2  ;;  %vm145_vm10 = vcmp.ge.s32.totalorder %v139_v55, %v851_v2 }
 0x819   :  { %447 = vadd.xlane.f32.xlu1 %v446_v9  ;;  %vm146_vm13 = vmand %vm145_vm10, %vm49_vm1  ;;  %vm194_vm1 = vcmp.eq.s32.totalorder %v851_v2, %v139_v55  ;;  %vm637_vm10 = vcmp.eq.s32.totalorder %v851_v2, 29 }
 0x87c   :  { %v404_v10 = vpop.xlane.xlu2 %403 }
 0x87d   :  { %v405_v11 = vsel %vm401_vm15, %v404_v10, %v387_v59 }
 0x87e   :  { %v420_v12 = vmul.f32 %v416_v54, %v405_v11 }
 0x880   :  { %421 = vadd.xlane.f32.xlu2 %v420_v12 }
 0x884   :  { %v426_v13 = vpop.xlane.xlu0 %425 }
 0x885   :  { %v427_v14 = vsel %vm419_vm2, %v426_v13, %v409_v63  ;;  %v142_v63 = vsel %vm140_vm8, %v42_v57, 0.0  ;;  %vm593_vm8 = vcmp.eq.s32.totalorder %v851_v2, 27 }
 0x886   :  { %v442_v15 = vmul.f32 %v434_v6, %v427_v14 }
 0x888   :  { %443 = vadd.xlane.f32.xlu0 %v442_v15 }
 0x88c   :  { %v448_v18 = vpop.xlane.xlu1 %447 }
 0x88d   :  { %v449_v21 = vsel %vm437_vm3, %v448_v18, %v431_v7 }
 0x88e   :  { %v464_v22 = vmul.f32 %v452_v19, %v449_v21 }
 0x890   :  { %465 = vadd.xlane.f32.xlu1 %v464_v22 }
 0x8f3   :  { %v422_v23 = vpop.xlane.xlu2 %421 }
 0x8f4   :  { %v423_v24 = vsel %vm419_vm2, %v422_v23, %v405_v11  ;;  %vm509_vm2 = vcmp.eq.s32.totalorder %v851_v2, 23 }
 0x8f5   :  { %v438_v25 = vmul.f32 %v434_v6, %v423_v24 }
 0x8f7   :  { %439 = vadd.xlane.f32.xlu2 %v438_v25 }
 0x8fb   :  { %v444_v26 = vpop.xlane.xlu0 %443 }
 0x8fc   :  { %v445_v27 = vsel %vm437_vm3, %v444_v26, %v427_v14 }
 0x8fd   :  { %v460_v28 = vmul.f32 %v452_v19, %v445_v27 }
 0x8ff   :  { %461 = vadd.xlane.f32.xlu0 %v460_v28 }
 0x903   :  { %v466_v30 = vpop.xlane.xlu1 %465 }
 0x904   :  { %v467_v32 = vsel %vm455_vm4, %v466_v30, %v449_v21  ;;  %v147_v21 = vsel %vm146_vm13, %v42_v57, 0.0  ;;  %vm681_vm13 = vcmp.eq.s32.totalorder %v851_v2, 31 }
 0x905   :  { %v482_v33 = vmul.f32 %v470_v31, %v467_v32 }
 0x907   :  { %483 = vadd.xlane.f32.xlu1 %v482_v33 }
 0x96a   :  { %v440_v34 = vpop.xlane.xlu2 %439 }
 0x96b   :  { %v441_v35 = vsel %vm437_vm3, %v440_v34, %v423_v24  ;;  %vm527_vm3 = vcmp.eq.s32.totalorder %v851_v2, 24 }
 0x96c   :  { %v456_v36 = vmul.f32 %v452_v19, %v441_v35 }
 0x96e   :  { %457 = vadd.xlane.f32.xlu2 %v456_v36  ;;  %v195_v36 = vsel %vm194_vm1, -1.0, %v837_v61 }
 0x972   :  { %v462_v37 = vpop.xlane.xlu0 %461 }
 0x973   :  { %v463_v38 = vsel %vm455_vm4, %v462_v37, %v445_v27 }
 0x974   :  { %v478_v39 = vmul.f32 %v470_v31, %v463_v38 }
 0x976   :  { %479 = vadd.xlane.f32.xlu0 %v478_v39 }
 0x97a   :  { %v484_v41 = vpop.xlane.xlu1 %483 }
 0x97b   :  { %v485_v43 = vsel %vm473_vm7, %v484_v41, %v467_v32 }
 0x97c   :  { %v500_v44 = vmul.f32 %v488_v42, %v485_v43 }
 0x97e   :  { %501 = vadd.xlane.f32.xlu1 %v500_v44 }
 0x9e1   :  { %v458_v45 = vpop.xlane.xlu2 %457 }
 0x9e2   :  { %v459_v46 = vsel %vm455_vm4, %v458_v45, %v441_v35  ;;  %vm549_vm4 = vcmp.eq.s32.totalorder %v851_v2, 25 }
 0x9e3   :  { %v474_v48 = vmul.f32 %v470_v31, %v459_v46 }
 0x9e5   :  { %475 = vadd.xlane.f32.xlu2 %v474_v48 }
 0x9e9   :  { %v480_v49 = vpop.xlane.xlu0 %479 }
 0x9ea   :  { %v481_v50 = vsel %vm473_vm7, %v480_v49, %v463_v38 }
 0x9eb   :  { %v496_v51 = vmul.f32 %v488_v42, %v481_v50 }
 0x9ed   :  { %497 = vadd.xlane.f32.xlu0 %v496_v51 }
 0x9f1   :  { %v502_v1 = vpop.xlane.xlu1 %501 }
 0x9f2   :  { %v503_v4 = vsel %vm491_vm9, %v502_v1, %v485_v43 }
 0x9f3   :  { %v518_v3 = vmul.f32 %v506_v60, %v503_v4 }
 0xa58   :  { %v476_v52 = vpop.xlane.xlu2 %475 }
 0xa59   :  { %v477_v53 = vsel %vm473_vm7, %v476_v52, %v459_v46  ;;  %vm571_vm7 = vcmp.eq.s32.totalorder %v851_v2, 26 }
 0xa5a   :  { %v492_v54 = vmul.f32 %v488_v42, %v477_v53 }
 0xa5c   :  { %493 = vadd.xlane.f32.xlu2 %v492_v54 }
 0xa60   :  { %v498_v59 = vpop.xlane.xlu0 %497 }
 0xa61   :  { %v499_v62 = vsel %vm491_vm9, %v498_v59, %v481_v50 }
 0xa62   :  { %v514_v0 = vmul.f32 %v506_v60, %v499_v62 }
 0xa64   :  { %143 = vadd.xlane.f32.xlu2 %v142_v63  ;;  %515 = vadd.xlane.f32.xlu1 %v514_v0 }
 0xa6c   :  { %519 = vadd.xlane.f32.xlu2 %v518_v3 }
 0xacf   :  { %v494_v6 = vpop.xlane.xlu2 %493 }
 0xad0   :  { %v495_v7 = vsel %vm491_vm9, %v494_v6, %v477_v53  ;;  %vm615_vm9 = vcmp.eq.s32.totalorder %v851_v2, 28 }
 0xad1   :  { %v510_v9 = vmul.f32 %v506_v60, %v495_v7 }
 0xad3   :  { %511 = vadd.xlane.f32.xlu0 %v510_v9 }
 0xad7   :  { %v982_v10 = vpop.xlane.xlu2 %143  ;;  %v516_v25 = vpop.xlane.xlu1 %515 }
 0xad8   :  { %834 = vrcp.f32 %v982_v10  ;;  %v159_v13 = vand.u32 2147483648, %v982_v10  ;;  %vm153_vm11 = vweird.f32 %v982_v10  ;;  %v157_v15 = vand.u32 2147483647, %v982_v10 }
 0xad9   :  { %v517_v29 = vsel %vm509_vm2, %v516_v25, %v499_v62 }
 0xada   :  { %v160_v18 = vor.u32 1.1754944e-38, %v159_v13  ;;  %vm158_vm15 = vcmp.eq.f32.partialorder %v157_v15, 8.507059e+37 }
 0xade   :  { %v835_v11 = vpop.eup %834 }
 0xadf   :  { %v149_v12 = vmul.f32 %v835_v11, %v982_v10  ;;  %vm154_vm12 = vweird.f32 %v835_v11  ;;  %v520_v26 = vpop.xlane.xlu2 %519 }
 0xae0   :  { %vm155_vm14 = vmor %vm153_vm11, %vm154_vm12  ;;  %v521_v30 = vsel %vm509_vm2, %v520_v26, %v503_v4  ;;  %vm659_vm12 = vcmp.eq.s32.totalorder %v851_v2, 30 }
 0xae1   :  { %v150_v14 = vsub.f32 1.0, %v149_v12 }
 0xae3   :  { %v151_v17 = vmul.f32 %v835_v11, %v150_v14 }
 0xae5   :  { %v152_v19 = vadd.f32 %v835_v11, %v151_v17 }
 0xae7   :  { %v156_v22 = vsel %vm155_vm14, %v835_v11, %v152_v19 }
 0xae8   :  { %v994_v23 = vsel %vm158_vm15, %v160_v18, %v156_v22 }
 0xae9   :  { %v162_v24 = vmul.f32 %v994_v23, %v147_v21 }
 0xaeb   :  { %163 = vst [vmem:[#allocation2 + $0x18] sm:$0xff] %v162_v24 }
 0xaf2   :  { %v523_v27 = vld [vmem:[#allocation2 + $0x18] ss:$0 sm:$0xff]  ;;  %v545_v38 = vld [vmem:[#allocation2 + $0x19] ss:$0 sm:$0xff]  ;;  %v567_v52 = vld [vmem:[#allocation2 + $0x1a] ss:$0 sm:$0xff] }
 0xaf3   :  { %v524_v28 = vxor.u32 2147483648, %v523_v27  ;;  %v546_v41 = vxor.u32 2147483648, %v545_v38  ;;  %v568_v55 = vxor.u32 2147483648, %v567_v52  ;;  %v589_v6 = vld [vmem:[#allocation2 + $0x1b] ss:$0 sm:$0xff] }
 0xaf4   :  { %v590_v11 = vxor.u32 2147483648, %v589_v6  ;;  %v611_v25 = vld [vmem:[#allocation2 + $0x1c] ss:$0 sm:$0xff] }
 0xaf5   :  { %v536_v31 = vmul.f32 %v524_v28, %v521_v30  ;;  %v532_v32 = vmul.f32 %v524_v28, %v517_v29  ;;  %v540_v37 = vmul.f32 %v524_v28, %v195_v36 }
 0xaf7   :  { %537 = vadd.xlane.f32.xlu2 %v536_v31  ;;  %533 = vadd.xlane.f32.xlu1 %v532_v32 }
 0xb46   :  { %v512_v33 = vpop.xlane.xlu0 %511 }
 0xb47   :  { %v513_v34 = vsel %vm509_vm2, %v512_v33, %v495_v7 }
 0xb48   :  { %v528_v35 = vmul.f32 %v524_v28, %v513_v34  ;;  %v612_v28 = vxor.u32 2147483648, %v611_v25 }
 0xb4a   :  { %529 = vadd.xlane.f32.xlu0 %v528_v35 }
 0xb52   :  { %541 = vadd.xlane.f32.xlu0 %v540_v37 }
 0xb6a   :  { %v538_v39 = vpop.xlane.xlu2 %537  ;;  %v534_v40 = vpop.xlane.xlu1 %533 }
 0xb6b   :  { %v539_v42 = vsel %vm527_vm3, %v538_v39, %v521_v30  ;;  %v535_v43 = vsel %vm527_vm3, %v534_v40, %v517_v29  ;;  %v633_v39 = vld [vmem:[#allocation2 + $0x1d] ss:$0 sm:$0xff] }
 0xb6c   :  { %v554_v44 = vmul.f32 %v546_v41, %v535_v43  ;;  %v558_v45 = vmul.f32 %v546_v41, %v539_v42 }
 0xb6e   :  { %555 = vadd.xlane.f32.xlu2 %v554_v44  ;;  %559 = vadd.xlane.f32.xlu0 %v558_v45 }
 0xbbd   :  { %v530_v46 = vpop.xlane.xlu0 %529 }
 0xbbe   :  { %v531_v48 = vsel %vm527_vm3, %v530_v46, %v513_v34 }
 0xbbf   :  { %v550_v49 = vmul.f32 %v546_v41, %v531_v48 }
 0xbc1   :  { %551 = vadd.xlane.f32.xlu1 %v550_v49 }
 0xbc5   :  { %v542_v50 = vpop.xlane.xlu0 %541 }
 0xbc6   :  { %v543_v61 = vsel %vm527_vm3, %v542_v50, %v195_v36 }
 0xbc7   :  { %v562_v51 = vmul.f32 %v546_v41, %v543_v61 }
 0xbc9   :  { %563 = vadd.xlane.f32.xlu1 %v562_v51 }
 0xbe1   :  { %v556_v53 = vpop.xlane.xlu2 %555  ;;  %v560_v54 = vpop.xlane.xlu0 %559 }
 0xbe2   :  { %v557_v56 = vsel %vm549_vm4, %v556_v53, %v535_v43  ;;  %v561_v57 = vsel %vm549_vm4, %v560_v54, %v539_v42  ;;  %v634_v42 = vxor.u32 2147483648, %v633_v39  ;;  %v655_v53 = vld [vmem:[#allocation2 + $0x1e] ss:$0 sm:$0xff] }
 0xbe3   :  { %v576_v59 = vmul.f32 %v568_v55, %v557_v56  ;;  %v580_v60 = vmul.f32 %v568_v55, %v561_v57 }
 0xbe5   :  { %577 = vadd.xlane.f32.xlu0 %v576_v59  ;;  %581 = vadd.xlane.f32.xlu1 %v580_v60 }
 0xc34   :  { %v552_v62 = vpop.xlane.xlu1 %551 }
 0xc35   :  { %v553_v63 = vsel %vm549_vm4, %v552_v62, %v531_v48 }
 0xc36   :  { %v572_v0 = vmul.f32 %v568_v55, %v553_v63 }
 0xc38   :  { %573 = vadd.xlane.f32.xlu2 %v572_v0 }
 0xc3c   :  { %v564_v1 = vpop.xlane.xlu1 %563 }
 0xc3d   :  { %v565_v4 = vsel %vm549_vm4, %v564_v1, %v543_v61 }
 0xc3e   :  { %v584_v3 = vmul.f32 %v568_v55, %v565_v4 }
 0xc40   :  { %585 = vadd.xlane.f32.xlu2 %v584_v3 }
 0xc58   :  { %v582_v7 = vpop.xlane.xlu1 %581  ;;  %v578_v9 = vpop.xlane.xlu0 %577 }
 0xc59   :  { %v583_v12 = vsel %vm571_vm7, %v582_v7, %v561_v57  ;;  %v579_v13 = vsel %vm571_vm7, %v578_v9, %v557_v56  ;;  %v656_v56 = vxor.u32 2147483648, %v655_v53  ;;  %v677_v7 = vld [vmem:[#allocation2 + $0x1f] ss:$0 sm:$0xff] }
 0xc5a   :  { %v602_v14 = vmul.f32 %v590_v11, %v583_v12  ;;  %v598_v15 = vmul.f32 %v590_v11, %v579_v13 }
 0xc5c   :  { %603 = vadd.xlane.f32.xlu2 %v602_v14  ;;  %599 = vadd.xlane.f32.xlu1 %v598_v15 }
 0xcab   :  { %v574_v17 = vpop.xlane.xlu2 %573 }
 0xcac   :  { %v575_v18 = vsel %vm571_vm7, %v574_v17, %v553_v63 }
 0xcad   :  { %v594_v19 = vmul.f32 %v590_v11, %v575_v18 }
 0xcaf   :  { %595 = vadd.xlane.f32.xlu0 %v594_v19 }
 0xcb3   :  { %v586_v21 = vpop.xlane.xlu2 %585 }
 0xcb4   :  { %v587_v22 = vsel %vm571_vm7, %v586_v21, %v565_v4 }
 0xcb5   :  { %v606_v24 = vmul.f32 %v590_v11, %v587_v22 }
 0xcb7   :  { %607 = vadd.xlane.f32.xlu0 %v606_v24 }
 0xccf   :  { %v604_v26 = vpop.xlane.xlu2 %603  ;;  %v600_v27 = vpop.xlane.xlu1 %599 }
 0xcd0   :  { %v605_v29 = vsel %vm593_vm8, %v604_v26, %v583_v12  ;;  %v601_v30 = vsel %vm593_vm8, %v600_v27, %v579_v13  ;;  %v678_v12 = vxor.u32 2147483648, %v677_v7 }
 0xcd1   :  { %v624_v31 = vmul.f32 %v612_v28, %v605_v29  ;;  %v620_v32 = vmul.f32 %v612_v28, %v601_v30 }
 0xcd3   :  { %625 = vadd.xlane.f32.xlu0 %v624_v31  ;;  %621 = vadd.xlane.f32.xlu2 %v620_v32 }
 0xd22   :  { %v596_v33 = vpop.xlane.xlu0 %595 }
 0xd23   :  { %v597_v34 = vsel %vm593_vm8, %v596_v33, %v575_v18 }
 0xd24   :  { %v616_v35 = vmul.f32 %v612_v28, %v597_v34 }
 0xd26   :  { %617 = vadd.xlane.f32.xlu1 %v616_v35 }
 0xd2a   :  { %v608_v36 = vpop.xlane.xlu0 %607 }
 0xd2b   :  { %v609_v37 = vsel %vm593_vm8, %v608_v36, %v587_v22 }
 0xd2c   :  { %v628_v38 = vmul.f32 %v612_v28, %v609_v37 }
 0xd2e   :  { %629 = vadd.xlane.f32.xlu1 %v628_v38 }
 0xd46   :  { %v622_v40 = vpop.xlane.xlu2 %621  ;;  %v626_v41 = vpop.xlane.xlu0 %625 }
 0xd47   :  { %v623_v43 = vsel %vm615_vm9, %v622_v40, %v601_v30  ;;  %v627_v44 = vsel %vm615_vm9, %v626_v41, %v605_v29 }
 0xd48   :  { %v642_v45 = vmul.f32 %v634_v42, %v623_v43  ;;  %v646_v46 = vmul.f32 %v634_v42, %v627_v44 }
 0xd4a   :  { %643 = vadd.xlane.f32.xlu0 %v642_v45  ;;  %647 = vadd.xlane.f32.xlu1 %v646_v46 }
 0xd99   :  { %v618_v48 = vpop.xlane.xlu1 %617 }
 0xd9a   :  { %v619_v49 = vsel %vm615_vm9, %v618_v48, %v597_v34 }
 0xd9b   :  { %v638_v50 = vmul.f32 %v634_v42, %v619_v49 }
 0xd9d   :  { %639 = vadd.xlane.f32.xlu2 %v638_v50 }
 0xda1   :  { %v630_v61 = vpop.xlane.xlu1 %629 }
 0xda2   :  { %v631_v51 = vsel %vm615_vm9, %v630_v61, %v609_v37 }
 0xda3   :  { %v650_v52 = vmul.f32 %v634_v42, %v631_v51 }
 0xda5   :  { %651 = vadd.xlane.f32.xlu2 %v650_v52 }
 0xdbd   :  { %v648_v54 = vpop.xlane.xlu1 %647  ;;  %v644_v55 = vpop.xlane.xlu0 %643 }
 0xdbe   :  { %v649_v57 = vsel %vm637_vm10, %v648_v54, %v627_v44  ;;  %v645_v59 = vsel %vm637_vm10, %v644_v55, %v623_v43 }
 0xdbf   :  { %v668_v60 = vmul.f32 %v656_v56, %v649_v57  ;;  %v664_v62 = vmul.f32 %v656_v56, %v645_v59 }
 0xdc1   :  { %669 = vadd.xlane.f32.xlu2 %v668_v60  ;;  %665 = vadd.xlane.f32.xlu1 %v664_v62 }
 0xe10   :  { %v640_v63 = vpop.xlane.xlu2 %639 }
 0xe11   :  { %v641_v0 = vsel %vm637_vm10, %v640_v63, %v619_v49 }
 0xe12   :  { %v660_v1 = vmul.f32 %v656_v56, %v641_v0 }
 0xe14   :  { %661 = vadd.xlane.f32.xlu0 %v660_v1 }
 0xe18   :  { %v652_v4 = vpop.xlane.xlu2 %651 }
 0xe19   :  { %v653_v3 = vsel %vm637_vm10, %v652_v4, %v631_v51 }
 0xe1a   :  { %v672_v6 = vmul.f32 %v656_v56, %v653_v3 }
 0xe1c   :  { %673 = vadd.xlane.f32.xlu0 %v672_v6 }
 0xe34   :  { %v670_v9 = vpop.xlane.xlu2 %669  ;;  %v666_v11 = vpop.xlane.xlu1 %665 }
 0xe35   :  { %v671_v13 = vsel %vm659_vm12, %v670_v9, %v649_v57  ;;  %v667_v14 = vsel %vm659_vm12, %v666_v11, %v645_v59 }
 0xe36   :  { %v690_v15 = vmul.f32 %v678_v12, %v671_v13  ;;  %v686_v17 = vmul.f32 %v678_v12, %v667_v14 }
 0xe38   :  { %691 = vadd.xlane.f32.xlu0 %v690_v15  ;;  %687 = vadd.xlane.f32.xlu2 %v686_v17 }
 0xe87   :  { %v662_v18 = vpop.xlane.xlu0 %661 }
 0xe88   :  { %v663_v19 = vsel %vm659_vm12, %v662_v18, %v641_v0 }
 0xe89   :  { %v682_v21 = vmul.f32 %v678_v12, %v663_v19 }
 0xe8b   :  { %683 = vadd.xlane.f32.xlu1 %v682_v21 }
 0xe8f   :  { %v674_v22 = vpop.xlane.xlu0 %673 }
 0xe90   :  { %v675_v24 = vsel %vm659_vm12, %v674_v22, %v653_v3 }
 0xe91   :  { %v694_v25 = vmul.f32 %v678_v12, %v675_v24 }
 0xe93   :  { %695 = vadd.xlane.f32.xlu1 %v694_v25 }
 0xeab   :  { %v688_v26 = vpop.xlane.xlu2 %687  ;;  %v692_v27 = vpop.xlane.xlu0 %691 }
 0xeac   :  { %v689_v28 = vsel %vm681_vm13, %v688_v26, %v667_v14  ;;  %v693_v29 = vsel %vm681_vm13, %v692_v27, %v671_v13 }
 0xead   :  { %v730_v30 = vmul.f32 %v689_v28, %v898_v58  ;;  %v749_v31 = vmul.f32 %v693_v29, %v931_v20 }
 0xeaf   :  { %v732_v32 = vsel %vm95_vm0, %v689_v28, %v730_v30  ;;  %v751_v33 = vsel %vm124_vm6, %v693_v29, %v749_v31 }
 0xeb0   :  { %810 = vst [vmem:[%s1041_s1 + $0x8] sm:$0xff] %v732_v32 }
 0xeb1   :  { %812 = vst [vmem:[%s1041_s1 + $0x10] sm:$0xff] %v751_v33 }
 0xefe   :  { %v684_v34 = vpop.xlane.xlu1 %683 }
 0xeff   :  { %v685_v58 = vsel %vm681_vm13, %v684_v34, %v663_v19 }
 0xf00   :  { %v712_v20 = vmul.f32 %v685_v58, %v871_v16 }
 0xf02   :  { %v714_v47 = vsel %vm66_vm5, %v685_v58, %v712_v20 }
 0xf03   :  { %808 = vst [vmem:[%s1041_s1] sm:$0xff] %v714_v47 }
 0xf06   :  { %v696_v8 = vpop.xlane.xlu1 %695 }
 0xf07   :  { %v697_v35 = vsel %vm681_vm13, %v696_v8, %v675_v24 }
 0xf08   :  { %v768_v36 = vmul.f32 %v697_v35, %v994_v23 }
 0xf0a   :  { %v770_v37 = vsel %vm153_vm11, %v697_v35, %v768_v36 }
 0xf0b   :  { %814 = vst [vmem:[%s1041_s1 + $0x18] sm:$0xff] %v770_v37 }

// kernel: custom-call.9
= control target key start
LH: loop header
LB: loop body
LE: loop exit
PB: predicated region body
PF: predicated region fallthrough
CT: control target
= control target key end

     0   :  { %v47_v0 = vlaneseq  ;;  %v835_v19 = vmov -1.0   ;;  %s1141_s0 = inlined_call_operand.vmem [shape: f32[1,32,32], index: 0, kind: input, shape index: {}]   ;;  %s1142_s1 = inlined_call_operand.vmem [shape: f32[1,32,32], index: 1, kind: output, shape index: {}]  }
   0x1   :  { %v42_v3 = vld [vmem:[%s1141_s0 + $0x18] sm:$0xff]  ;;  %v40_v35 = vld [vmem:[%s1141_s0 + $0x10] sm:$0xff] }
   0x2   :  { %v847_v1 = vand.u32 127, %v47_v0  ;;  %v849_v2 = vshrl.u32 %v47_v0, 7 }
   0x4   :  { %v139_v4 = vadd.s32 24, %v849_v2  ;;  %vm49_vm1 = vcmp.lt.s32.totalorder %v847_v1, 32  ;;  %vm193_vm8 = vcmp.eq.s32.totalorder %v847_v1, 31  ;;  %vm201_vm10 = vcmp.eq.s32.totalorder %v847_v1, 30 }
   0x5   :  { %v194_v20 = vsel %vm193_vm8, 1.0, %v835_v19  ;;  %vm211_vm11 = vcmp.eq.s32.totalorder %v847_v1, 29  ;;  %v110_v36 = vadd.s32 16, %v849_v2  ;;  %vm221_vm13 = vcmp.eq.s32.totalorder %v847_v1, 28 }
   0x6   :  { %vm140_vm0 = vcmp.eq.s32.totalorder %v139_v4, %v847_v1  ;;  %vm145_vm2 = vcmp.le.s32.totalorder %v139_v4, %v847_v1  ;;  %vm190_vm9 = vcmp.eq.s32.totalorder %v847_v1, %v139_v4 }
   0x7   :  { %v142_v5 = vsel %vm140_vm0, %v42_v3, 0.0  ;;  %vm146_vm3 = vmand %vm145_vm2, %vm49_vm1  ;;  %v195_v21 = vsel %vm190_vm9, %v194_v20, 0.0  ;;  %vm111_vm12 = vcmp.eq.s32.totalorder %v110_v36, %v847_v1  ;;  %vm116_vm14 = vcmp.le.s32.totalorder %v110_v36, %v847_v1 }
   0x8   :  { %143 = vadd.xlane.f32.xlu0 %v142_v5  ;;  %v147_v14 = vsel %vm146_vm3, %v42_v3, 0.0  ;;  %v113_v37 = vsel %vm111_vm12, %v40_v35, 0.0  ;;  %vm117_vm2 = vmand %vm116_vm14, %vm49_vm1  ;;  %vm183_vm8 = vcmp.eq.s32.totalorder %v847_v1, %v110_v36  ;;  %vm251_vm9 = vcmp.eq.s32.totalorder %v847_v1, 25 }
   0x9   :  { %v118_v52 = vsel %vm117_vm2, %v40_v35, 0.0  ;;  %vm285_vm12 = vcmp.eq.s32.totalorder %v847_v1, 22  ;;  %vm313_vm14 = vcmp.eq.s32.totalorder %v847_v1, 20  ;;  %vm341_vm2 = vcmp.eq.s32.totalorder %v847_v1, 18 }
  0x7b   :  { %v856_v6 = vpop.xlane.xlu0 %143 }
  0x7c   :  { %827 = vrcp.f32 %v856_v6  ;;  %v159_v10 = vand.u32 2147483648, %v856_v6  ;;  %v157_v12 = vand.u32 2147483647, %v856_v6  ;;  %vm153_vm5 = vweird.f32 %v856_v6 }
  0x7e   :  { %v160_v15 = vor.u32 1.1754944e-38, %v159_v10  ;;  %vm158_vm7 = vcmp.eq.f32.partialorder %v157_v12, 8.507059e+37 }
  0x82   :  { %v828_v7 = vpop.eup %827 }
  0x83   :  { %v149_v8 = vmul.f32 %v828_v7, %v856_v6  ;;  %vm154_vm4 = vweird.f32 %v828_v7 }
  0x84   :  { %vm155_vm6 = vmor %vm153_vm5, %vm154_vm4 }
  0x85   :  { %v150_v9 = vsub.f32 1.0, %v149_v8 }
  0x87   :  { %v151_v11 = vmul.f32 %v828_v7, %v150_v9 }
  0x89   :  { %v152_v13 = vadd.f32 %v828_v7, %v151_v11 }
  0x8b   :  { %v156_v16 = vsel %vm155_vm6, %v828_v7, %v152_v13  ;;  %vm231_vm6 = vcmp.eq.s32.totalorder %v847_v1, 27  ;;  %v836_v7 = vmov 0.0  }
  0x8c   :  { %v869_v17 = vsel %vm158_vm7, %v160_v15, %v156_v16  ;;  %vm241_vm7 = vcmp.eq.s32.totalorder %v847_v1, 26  ;;  %v184_v8 = vsel %vm183_vm8, -1.0, %v836_v7 }
  0x8d   :  { %v162_v18 = vmul.f32 %v869_v17, %v147_v14 }
  0x8f   :  { %163 = vst [vmem:[#allocation2 + $0x18] sm:$0xff] %v162_v18 }
  0x96   :  { %v197_v22 = vld [vmem:[#allocation2 + $0x1e] ss:$0 sm:$0xff]  ;;  %v207_v25 = vld [vmem:[#allocation2 + $0x1d] ss:$0 sm:$0xff]  ;;  %v217_v30 = vld [vmem:[#allocation2 + $0x1c] ss:$0 sm:$0xff] }
  0x97   :  { %v198_v23 = vxor.u32 2147483648, %v197_v22  ;;  %v208_v27 = vxor.u32 2147483648, %v207_v25  ;;  %v218_v32 = vxor.u32 2147483648, %v217_v30  ;;  %v227_v38 = vld [vmem:[#allocation2 + $0x1b] ss:$0 sm:$0xff] }
  0x98   :  { %v228_v40 = vxor.u32 2147483648, %v227_v38  ;;  %v237_v56 = vld [vmem:[#allocation2 + $0x1a] ss:$0 sm:$0xff]  ;;  %v247_v61 = vld [vmem:[#allocation2 + $0x19] ss:$0 sm:$0xff] }
  0x99   :  { %v202_v24 = vmul.f32 %v198_v23, %v195_v21  ;;  %v238_v58 = vxor.u32 2147483648, %v237_v56  ;;  %v248_v63 = vxor.u32 2147483648, %v247_v61  ;;  %v257_v10 = vld [vmem:[#allocation2 + $0x18] ss:$0 sm:$0xff] }
  0x9a   :  { %v258_v12 = vxor.u32 2147483648, %v257_v10 }
  0x9b   :  { %203 = vadd.xlane.f32.xlu0 %v202_v24 }
 0x10e   :  { %v204_v26 = vpop.xlane.xlu0 %203 }
 0x10f   :  { %v205_v28 = vsel %vm201_vm10, %v204_v26, %v195_v21  ;;  %vm271_vm10 = vcmp.eq.s32.totalorder %v847_v1, 23 }
 0x110   :  { %v212_v29 = vmul.f32 %v208_v27, %v205_v28 }
 0x112   :  { %213 = vadd.xlane.f32.xlu1 %v212_v29 }
 0x185   :  { %v214_v31 = vpop.xlane.xlu1 %213 }
 0x186   :  { %v215_v33 = vsel %vm211_vm11, %v214_v31, %v205_v28  ;;  %vm261_vm11 = vcmp.eq.s32.totalorder %v847_v1, 24 }
 0x187   :  { %v222_v34 = vmul.f32 %v218_v32, %v215_v33 }
 0x189   :  { %223 = vadd.xlane.f32.xlu1 %v222_v34 }
 0x191   :  { %114 = vadd.xlane.f32.xlu1 %v113_v37 }
 0x1fc   :  { %v224_v39 = vpop.xlane.xlu1 %223 }
 0x1fd   :  { %v225_v41 = vsel %vm221_vm13, %v224_v39, %v215_v33  ;;  %vm299_vm13 = vcmp.eq.s32.totalorder %v847_v1, 21 }
 0x1fe   :  { %v232_v42 = vmul.f32 %v228_v40, %v225_v41 }
 0x200   :  { %233 = vadd.xlane.f32.xlu2 %v232_v42 }
 0x204   :  { %v882_v43 = vpop.xlane.xlu1 %114 }
 0x205   :  { %829 = vrcp.f32 %v882_v43  ;;  %v130_v46 = vand.u32 2147483648, %v882_v43  ;;  %vm124_vm15 = vweird.f32 %v882_v43  ;;  %v128_v48 = vand.u32 2147483647, %v882_v43 }
 0x207   :  { %v131_v50 = vor.u32 1.1754944e-38, %v130_v46  ;;  %vm129_vm4 = vcmp.eq.f32.partialorder %v128_v48, 8.507059e+37 }
 0x20b   :  { %v830_v44 = vpop.eup %829 }
 0x20c   :  { %v120_v45 = vmul.f32 %v830_v44, %v882_v43  ;;  %vm125_vm0 = vweird.f32 %v830_v44 }
 0x20d   :  { %vm126_vm3 = vmor %vm124_vm15, %vm125_vm0  ;;  %vm327_vm0 = vcmp.eq.s32.totalorder %v847_v1, 19 }
 0x20e   :  { %v121_v47 = vsub.f32 1.0, %v120_v45 }
 0x210   :  { %v122_v49 = vmul.f32 %v830_v44, %v121_v47 }
 0x212   :  { %v123_v51 = vadd.f32 %v830_v44, %v122_v49 }
 0x214   :  { %v127_v53 = vsel %vm126_vm3, %v830_v44, %v123_v51  ;;  %vm355_vm3 = vcmp.eq.s32.totalorder %v847_v1, 17 }
 0x215   :  { %v894_v54 = vsel %vm129_vm4, %v131_v50, %v127_v53 }
 0x216   :  { %v133_v55 = vmul.f32 %v894_v54, %v118_v52 }
 0x218   :  { %134 = vst [vmem:[#allocation2 + $0x10] sm:$0xff] %v133_v55 }
 0x21f   :  { %v267_v3 = vld [vmem:[#allocation2 + $0x17] ss:$0 sm:$0xff]  ;;  %v281_v15 = vld [vmem:[#allocation2 + $0x16] ss:$0 sm:$0xff]  ;;  %v295_v24 = vld [vmem:[#allocation2 + $0x15] ss:$0 sm:$0xff] }
 0x220   :  { %v268_v5 = vxor.u32 2147483648, %v267_v3  ;;  %v282_v16 = vxor.u32 2147483648, %v281_v15  ;;  %v296_v26 = vxor.u32 2147483648, %v295_v24  ;;  %v309_v32 = vld [vmem:[#allocation2 + $0x14] ss:$0 sm:$0xff] }
 0x221   :  { %v310_v34 = vxor.u32 2147483648, %v309_v32  ;;  %v323_v40 = vld [vmem:[#allocation2 + $0x13] ss:$0 sm:$0xff]  ;;  %v337_v49 = vld [vmem:[#allocation2 + $0x12] ss:$0 sm:$0xff] }
 0x222   :  { %v272_v9 = vmul.f32 %v268_v5, %v184_v8  ;;  %v324_v42 = vxor.u32 2147483648, %v323_v40  ;;  %v338_v51 = vxor.u32 2147483648, %v337_v49 }
 0x273   :  { %v234_v57 = vpop.xlane.xlu2 %233 }
 0x274   :  { %v235_v59 = vsel %vm231_vm6, %v234_v57, %v225_v41 }
 0x275   :  { %v242_v60 = vmul.f32 %v238_v58, %v235_v59  ;;  %v351_v58 = vld [vmem:[#allocation2 + $0x11] ss:$0 sm:$0xff] }
 0x277   :  { %243 = vadd.xlane.f32.xlu2 %v242_v60  ;;  %v352_v60 = vxor.u32 2147483648, %v351_v58 }
 0x2ea   :  { %v244_v62 = vpop.xlane.xlu2 %243 }
 0x2eb   :  { %v245_v0 = vsel %vm241_vm7, %v244_v62, %v235_v59 }
 0x2ec   :  { %v252_v4 = vmul.f32 %v248_v63, %v245_v0 }
 0x2ee   :  { %253 = vadd.xlane.f32.xlu0 %v252_v4  ;;  %v81_v4 = vadd.s32 8, %v849_v2 }
 0x2f0   :  { %vm82_vm4 = vcmp.eq.s32.totalorder %v81_v4, %v847_v1  ;;  %vm87_vm6 = vcmp.le.s32.totalorder %v81_v4, %v847_v1 }
 0x2f6   :  { %273 = vadd.xlane.f32.xlu0 %v272_v9 }
 0x361   :  { %v254_v11 = vpop.xlane.xlu0 %253 }
 0x362   :  { %v255_v13 = vsel %vm251_vm9, %v254_v11, %v245_v0  ;;  %vm88_vm9 = vmand %vm87_vm6, %vm49_vm1  ;;  %vm473_vm6 = vcmp.eq.s32.totalorder %v847_v1, 10 }
 0x363   :  { %v262_v14 = vmul.f32 %v258_v12, %v255_v13 }
 0x365   :  { %263 = vadd.xlane.f32.xlu2 %v262_v14 }
 0x369   :  { %v274_v18 = vpop.xlane.xlu0 %273 }
 0x36a   :  { %v275_v19 = vsel %vm271_vm10, %v274_v18, %v184_v8  ;;  %v38_v8 = vld [vmem:[%s1141_s0 + $0x8] sm:$0xff] }
 0x36b   :  { %v286_v20 = vmul.f32 %v282_v16, %v275_v19  ;;  %v84_v12 = vsel %vm82_vm4, %v38_v8, 0.0  ;;  %vm455_vm4 = vcmp.eq.s32.totalorder %v847_v1, 11 }
 0x36d   :  { %287 = vadd.xlane.f32.xlu2 %v286_v20 }
 0x3d8   :  { %v264_v21 = vpop.xlane.xlu2 %263 }
 0x3d9   :  { %v265_v22 = vsel %vm261_vm11, %v264_v21, %v255_v13 }
 0x3da   :  { %v276_v23 = vmul.f32 %v268_v5, %v265_v22  ;;  %v365_v5 = vld [vmem:[#allocation2 + $0x10] ss:$0 sm:$0xff] }
 0x3db   :  { %v366_v10 = vxor.u32 2147483648, %v365_v5 }
 0x3dc   :  { %277 = vadd.xlane.f32.xlu1 %v276_v23 }
 0x3e0   :  { %v288_v25 = vpop.xlane.xlu2 %287 }
 0x3e1   :  { %v289_v27 = vsel %vm285_vm12, %v288_v25, %v275_v19 }
 0x3e2   :  { %v300_v28 = vmul.f32 %v296_v26, %v289_v27 }
 0x3e4   :  { %301 = vadd.xlane.f32.xlu1 %v300_v28 }
 0x44f   :  { %v278_v29 = vpop.xlane.xlu1 %277 }
 0x450   :  { %v279_v30 = vsel %vm271_vm10, %v278_v29, %v265_v22 }
 0x451   :  { %v290_v31 = vmul.f32 %v282_v16, %v279_v30 }
 0x453   :  { %291 = vadd.xlane.f32.xlu0 %v290_v31 }
 0x457   :  { %v302_v33 = vpop.xlane.xlu1 %301 }
 0x458   :  { %v303_v35 = vsel %vm299_vm13, %v302_v33, %v289_v27  ;;  %v89_v27 = vsel %vm88_vm9, %v38_v8, 0.0  ;;  %vm491_vm9 = vcmp.eq.s32.totalorder %v847_v1, 9 }
 0x459   :  { %v314_v36 = vmul.f32 %v310_v34, %v303_v35 }
 0x45b   :  { %315 = vadd.xlane.f32.xlu0 %v314_v36 }
 0x4c6   :  { %v292_v37 = vpop.xlane.xlu0 %291 }
 0x4c7   :  { %v293_v38 = vsel %vm285_vm12, %v292_v37, %v279_v30  ;;  %vm176_vm12 = vcmp.eq.s32.totalorder %v847_v1, %v81_v4 }
 0x4c8   :  { %v304_v39 = vmul.f32 %v296_v26, %v293_v38  ;;  %v177_v33 = vsel %vm176_vm12, -1.0, %v836_v7 }
 0x4ca   :  { %305 = vadd.xlane.f32.xlu2 %v304_v39 }
 0x4ce   :  { %v316_v41 = vpop.xlane.xlu0 %315 }
 0x4cf   :  { %v317_v44 = vsel %vm313_vm14, %v316_v41, %v303_v35 }
 0x4d0   :  { %v328_v45 = vmul.f32 %v324_v42, %v317_v44 }
 0x4d2   :  { %329 = vadd.xlane.f32.xlu2 %v328_v45 }
 0x53d   :  { %v306_v46 = vpop.xlane.xlu2 %305 }
 0x53e   :  { %v307_v47 = vsel %vm299_vm13, %v306_v46, %v293_v38  ;;  %vm369_vm13 = vcmp.eq.s32.totalorder %v847_v1, 16 }
 0x53f   :  { %v318_v48 = vmul.f32 %v310_v34, %v307_v47 }
 0x541   :  { %319 = vadd.xlane.f32.xlu1 %v318_v48 }
 0x545   :  { %v330_v50 = vpop.xlane.xlu2 %329 }
 0x546   :  { %v331_v52 = vsel %vm327_vm0, %v330_v50, %v317_v44 }
 0x547   :  { %v342_v53 = vmul.f32 %v338_v51, %v331_v52 }
 0x549   :  { %343 = vadd.xlane.f32.xlu1 %v342_v53 }
 0x5b4   :  { %v320_v55 = vpop.xlane.xlu1 %319 }
 0x5b5   :  { %v321_v56 = vsel %vm313_vm14, %v320_v55, %v307_v47  ;;  %vm383_vm14 = vcmp.eq.s32.totalorder %v847_v1, 15 }
 0x5b6   :  { %v332_v57 = vmul.f32 %v324_v42, %v321_v56 }
 0x5b8   :  { %333 = vadd.xlane.f32.xlu0 %v332_v57 }
 0x5bc   :  { %v344_v59 = vpop.xlane.xlu1 %343 }
 0x5bd   :  { %v345_v61 = vsel %vm341_vm2, %v344_v59, %v331_v52 }
 0x5be   :  { %v356_v62 = vmul.f32 %v352_v60, %v345_v61 }
 0x5c0   :  { %357 = vadd.xlane.f32.xlu0 %v356_v62 }
 0x62b   :  { %v334_v63 = vpop.xlane.xlu0 %333 }
 0x62c   :  { %v335_v0 = vsel %vm327_vm0, %v334_v63, %v321_v56  ;;  %vm401_vm0 = vcmp.eq.s32.totalorder %v847_v1, 14 }
 0x62d   :  { %v346_v3 = vmul.f32 %v338_v51, %v335_v0 }
 0x62f   :  { %347 = vadd.xlane.f32.xlu2 %v346_v3 }
 0x633   :  { %v358_v9 = vpop.xlane.xlu0 %357 }
 0x634   :  { %v359_v11 = vsel %vm355_vm3, %v358_v9, %v345_v61 }
 0x635   :  { %v370_v13 = vmul.f32 %v366_v10, %v359_v11 }
 0x637   :  { %371 = vadd.xlane.f32.xlu0 %v370_v13  ;;  %85 = vadd.xlane.f32.xlu2 %v84_v12 }
 0x6a2   :  { %v348_v14 = vpop.xlane.xlu2 %347 }
 0x6a3   :  { %v349_v15 = vsel %vm341_vm2, %v348_v14, %v335_v0  ;;  %vm419_vm2 = vcmp.eq.s32.totalorder %v847_v1, 13 }
 0x6a4   :  { %v360_v16 = vmul.f32 %v352_v60, %v349_v15 }
 0x6a6   :  { %361 = vadd.xlane.f32.xlu1 %v360_v16 }
 0x6aa   :  { %v941_v18 = vpop.xlane.xlu2 %85  ;;  %v372_v31 = vpop.xlane.xlu0 %371 }
 0x6ab   :  { %831 = vrcp.f32 %v941_v18  ;;  %v101_v21 = vand.u32 2147483648, %v941_v18  ;;  %vm95_vm7 = vweird.f32 %v941_v18  ;;  %v99_v23 = vand.u32 2147483647, %v941_v18 }
 0x6ac   :  { %v373_v35 = vsel %vm369_vm13, %v372_v31, %v359_v11 }
 0x6ad   :  { %v102_v25 = vor.u32 1.1754944e-38, %v101_v21  ;;  %vm100_vm11 = vcmp.eq.f32.partialorder %v99_v23, 8.507059e+37 }
 0x6b1   :  { %v832_v19 = vpop.eup %831 }
 0x6b2   :  { %v91_v20 = vmul.f32 %v832_v19, %v941_v18  ;;  %vm96_vm8 = vweird.f32 %v832_v19 }
 0x6b3   :  { %vm97_vm10 = vmor %vm95_vm7, %vm96_vm8  ;;  %vm53_vm8 = vcmp.eq.s32.totalorder %v849_v2, %v847_v1 }
 0x6b4   :  { %v92_v22 = vsub.f32 1.0, %v91_v20 }
 0x6b6   :  { %v93_v24 = vmul.f32 %v832_v19, %v92_v22 }
 0x6b8   :  { %v94_v26 = vadd.f32 %v832_v19, %v93_v24 }
 0x6ba   :  { %v98_v28 = vsel %vm97_vm10, %v832_v19, %v94_v26  ;;  %vm58_vm10 = vcmp.le.s32.totalorder %v849_v2, %v847_v1 }
 0x6bb   :  { %v953_v29 = vsel %vm100_vm11, %v102_v25, %v98_v28 }
 0x6bc   :  { %v104_v30 = vmul.f32 %v953_v29, %v89_v27 }
 0x6be   :  { %105 = vst [vmem:[#allocation2 + $0x8] sm:$0xff] %v104_v30 }
 0x6c5   :  { %v379_v32 = vld [vmem:[#allocation2 + $0xf] ss:$0 sm:$0xff]  ;;  %v397_v41 = vld [vmem:[#allocation2 + $0xe] ss:$0 sm:$0xff]  ;;  %v415_v53 = vld [vmem:[#allocation2 + $0xd] ss:$0 sm:$0xff] }
 0x6c6   :  { %v380_v34 = vxor.u32 2147483648, %v379_v32  ;;  %v398_v42 = vxor.u32 2147483648, %v397_v41  ;;  %v416_v57 = vxor.u32 2147483648, %v415_v53  ;;  %v433_v3 = vld [vmem:[#allocation2 + $0xc] ss:$0 sm:$0xff] }
 0x6c7   :  { %v434_v8 = vxor.u32 2147483648, %v433_v3  ;;  %v451_v16 = vld [vmem:[#allocation2 + $0xb] ss:$0 sm:$0xff]  ;;  %v469_v30 = vld [vmem:[#allocation2 + $0xa] ss:$0 sm:$0xff] }
 0x6c8   :  { %v388_v36 = vmul.f32 %v380_v34, %v373_v35  ;;  %v384_v37 = vmul.f32 %v380_v34, %v177_v33  ;;  %v452_v21 = vxor.u32 2147483648, %v451_v16  ;;  %v487_v41 = vld [vmem:[#allocation2 + $0x9] ss:$0 sm:$0xff] }
 0x6ca   :  { %389 = vadd.xlane.f32.xlu0 %v388_v36  ;;  %385 = vadd.xlane.f32.xlu2 %v384_v37 }
 0x719   :  { %v362_v38 = vpop.xlane.xlu1 %361 }
 0x71a   :  { %v363_v39 = vsel %vm355_vm3, %v362_v38, %v349_v15  ;;  %vm437_vm3 = vcmp.eq.s32.totalorder %v847_v1, 12 }
 0x71b   :  { %v374_v40 = vmul.f32 %v366_v10, %v363_v39 }
 0x71d   :  { %375 = vadd.xlane.f32.xlu1 %v374_v40 }
 0x73d   :  { %v390_v44 = vpop.xlane.xlu0 %389  ;;  %v386_v45 = vpop.xlane.xlu2 %385 }
 0x73e   :  { %v391_v46 = vsel %vm383_vm14, %v390_v44, %v373_v35  ;;  %v387_v47 = vsel %vm383_vm14, %v386_v45, %v177_v33  ;;  %v470_v33 = vxor.u32 2147483648, %v469_v30  ;;  %v488_v45 = vxor.u32 2147483648, %v487_v41 }
 0x73f   :  { %v406_v48 = vmul.f32 %v398_v42, %v391_v46  ;;  %v402_v49 = vmul.f32 %v398_v42, %v387_v47 }
 0x741   :  { %407 = vadd.xlane.f32.xlu0 %v406_v48  ;;  %403 = vadd.xlane.f32.xlu2 %v402_v49 }
 0x790   :  { %v376_v50 = vpop.xlane.xlu1 %375 }
 0x791   :  { %v377_v51 = vsel %vm369_vm13, %v376_v50, %v363_v39  ;;  %v36_v50 = vld [vmem:[%s1141_s0] sm:$0xff]  ;;  %vm59_vm13 = vmand %vm58_vm10, %vm49_vm1  ;;  %vm509_vm1 = vcmp.eq.s32.totalorder %v847_v1, 8  ;;  %vm637_vm10 = vcmp.eq.s32.totalorder %v847_v1, 2 }
 0x792   :  { %v392_v52 = vmul.f32 %v380_v34, %v377_v51 }
 0x794   :  { %393 = vadd.xlane.f32.xlu1 %v392_v52 }
 0x7b4   :  { %v408_v55 = vpop.xlane.xlu0 %407  ;;  %v404_v56 = vpop.xlane.xlu2 %403 }
 0x7b5   :  { %v409_v58 = vsel %vm401_vm0, %v408_v55, %v391_v46  ;;  %v405_v59 = vsel %vm401_vm0, %v404_v56, %v387_v47  ;;  %v505_v56 = vld [vmem:[#allocation2 + $0x8] ss:$0 sm:$0xff] }
 0x7b6   :  { %v424_v60 = vmul.f32 %v416_v57, %v409_v58  ;;  %v420_v61 = vmul.f32 %v416_v57, %v405_v59 }
 0x7b8   :  { %425 = vadd.xlane.f32.xlu0 %v424_v60  ;;  %421 = vadd.xlane.f32.xlu2 %v420_v61 }
 0x807   :  { %v394_v62 = vpop.xlane.xlu1 %393 }
 0x808   :  { %v395_v63 = vsel %vm383_vm14, %v394_v62, %v377_v51  ;;  %v55_v51 = vsel %vm53_vm8, %v36_v50, 0.0  ;;  %vm593_vm8 = vcmp.eq.s32.totalorder %v847_v1, 4 }
 0x809   :  { %v410_v0 = vmul.f32 %v398_v42, %v395_v63 }
 0x80b   :  { %411 = vadd.xlane.f32.xlu1 %v410_v0 }
 0x82b   :  { %v426_v4 = vpop.xlane.xlu0 %425  ;;  %v422_v5 = vpop.xlane.xlu2 %421 }
 0x82c   :  { %v427_v9 = vsel %vm419_vm2, %v426_v4, %v409_v58  ;;  %v423_v10 = vsel %vm419_vm2, %v422_v5, %v405_v59  ;;  %v506_v58 = vxor.u32 2147483648, %v505_v56 }
 0x82d   :  { %v442_v11 = vmul.f32 %v434_v8, %v427_v9  ;;  %v438_v12 = vmul.f32 %v434_v8, %v423_v10 }
 0x82f   :  { %443 = vadd.xlane.f32.xlu0 %v442_v11  ;;  %439 = vadd.xlane.f32.xlu2 %v438_v12 }
 0x87e   :  { %v412_v13 = vpop.xlane.xlu1 %411 }
 0x87f   :  { %v413_v14 = vsel %vm401_vm0, %v412_v13, %v395_v63 }
 0x880   :  { %v428_v15 = vmul.f32 %v416_v57, %v413_v14 }
 0x882   :  { %429 = vadd.xlane.f32.xlu1 %v428_v15 }
 0x8a2   :  { %v444_v19 = vpop.xlane.xlu0 %443  ;;  %v440_v20 = vpop.xlane.xlu2 %439 }
 0x8a3   :  { %v445_v22 = vsel %vm437_vm3, %v444_v19, %v427_v9  ;;  %v441_v23 = vsel %vm437_vm3, %v440_v20, %v423_v10  ;;  %v60_v10 = vsel %vm59_vm13, %v36_v50, 0.0  ;;  %vm680_vm13 = vcmp.eq.s32.totalorder %v847_v1, 0 }
 0x8a4   :  { %v460_v24 = vmul.f32 %v452_v21, %v445_v22  ;;  %v456_v25 = vmul.f32 %v452_v21, %v441_v23 }
 0x8a6   :  { %461 = vadd.xlane.f32.xlu0 %v460_v24  ;;  %457 = vadd.xlane.f32.xlu2 %v456_v25 }
 0x8f5   :  { %v430_v26 = vpop.xlane.xlu1 %429 }
 0x8f6   :  { %v431_v27 = vsel %vm419_vm2, %v430_v26, %v413_v14  ;;  %vm169_vm2 = vcmp.eq.s32.totalorder %v847_v1, %v849_v2 }
 0x8f7   :  { %v446_v28 = vmul.f32 %v434_v8, %v431_v27  ;;  %v170_v14 = vsel %vm169_vm2, -1.0, %v836_v7 }
 0x8f9   :  { %447 = vadd.xlane.f32.xlu1 %v446_v28 }
 0x919   :  { %v462_v31 = vpop.xlane.xlu0 %461  ;;  %v458_v32 = vpop.xlane.xlu2 %457 }
 0x91a   :  { %v463_v34 = vsel %vm455_vm4, %v462_v31, %v445_v22  ;;  %v459_v35 = vsel %vm455_vm4, %v458_v32, %v441_v23 }
 0x91b   :  { %v478_v36 = vmul.f32 %v470_v33, %v463_v34  ;;  %v474_v37 = vmul.f32 %v470_v33, %v459_v35 }
 0x91d   :  { %479 = vadd.xlane.f32.xlu0 %v478_v36  ;;  %475 = vadd.xlane.f32.xlu2 %v474_v37 }
 0x96c   :  { %v448_v38 = vpop.xlane.xlu1 %447 }
 0x96d   :  { %v449_v39 = vsel %vm437_vm3, %v448_v38, %v431_v27  ;;  %vm527_vm3 = vcmp.eq.s32.totalorder %v847_v1, 7 }
 0x96e   :  { %v464_v40 = vmul.f32 %v452_v21, %v449_v39 }
 0x970   :  { %465 = vadd.xlane.f32.xlu1 %v464_v40 }
 0x990   :  { %v480_v42 = vpop.xlane.xlu0 %479  ;;  %v476_v44 = vpop.xlane.xlu2 %475 }
 0x991   :  { %v481_v46 = vsel %vm473_vm6, %v480_v42, %v463_v34  ;;  %v477_v47 = vsel %vm473_vm6, %v476_v44, %v459_v35 }
 0x992   :  { %v496_v48 = vmul.f32 %v488_v45, %v481_v46  ;;  %v492_v49 = vmul.f32 %v488_v45, %v477_v47 }
 0x994   :  { %497 = vadd.xlane.f32.xlu0 %v496_v48  ;;  %493 = vadd.xlane.f32.xlu2 %v492_v49 }
 0x99c   :  { %56 = vadd.xlane.f32.xlu2 %v55_v51 }
 0x9e3   :  { %v466_v52 = vpop.xlane.xlu1 %465 }
 0x9e4   :  { %v467_v53 = vsel %vm455_vm4, %v466_v52, %v449_v39  ;;  %vm549_vm4 = vcmp.eq.s32.totalorder %v847_v1, 6 }
 0x9e5   :  { %v482_v55 = vmul.f32 %v470_v33, %v467_v53 }
 0x9e7   :  { %483 = vadd.xlane.f32.xlu1 %v482_v55 }
 0xa07   :  { %v494_v57 = vpop.xlane.xlu2 %493  ;;  %v498_v23 = vpop.xlane.xlu0 %497 }
 0xa08   :  { %v495_v59 = vsel %vm491_vm9, %v494_v57, %v477_v47  ;;  %v499_v24 = vsel %vm491_vm9, %v498_v23, %v481_v46 }
 0xa09   :  { %v510_v60 = vmul.f32 %v506_v58, %v495_v59  ;;  %v514_v25 = vmul.f32 %v506_v58, %v499_v24 }
 0xa0b   :  { %511 = vadd.xlane.f32.xlu0 %v510_v60 }
 0xa0f   :  { %v1013_v61 = vpop.xlane.xlu2 %56 }
 0xa10   :  { %833 = vrcp.f32 %v1013_v61  ;;  %v72_v0 = vand.u32 2147483648, %v1013_v61  ;;  %vm66_vm11 = vweird.f32 %v1013_v61  ;;  %v70_v4 = vand.u32 2147483647, %v1013_v61 }
 0xa12   :  { %v73_v8 = vor.u32 1.1754944e-38, %v72_v0  ;;  %vm71_vm0 = vcmp.eq.f32.partialorder %v70_v4, 8.507059e+37 }
 0xa16   :  { %v834_v62 = vpop.eup %833 }
 0xa17   :  { %v62_v63 = vmul.f32 %v834_v62, %v1013_v61  ;;  %vm67_vm12 = vweird.f32 %v834_v62 }
 0xa18   :  { %vm68_vm14 = vmor %vm66_vm11, %vm67_vm12  ;;  %vm659_vm12 = vcmp.eq.s32.totalorder %v847_v1, 1 }
 0xa19   :  { %v63_v3 = vsub.f32 1.0, %v62_v63 }
 0xa1b   :  { %v64_v5 = vmul.f32 %v834_v62, %v63_v3 }
 0xa1d   :  { %v65_v9 = vadd.f32 %v834_v62, %v64_v5 }
 0xa1f   :  { %v69_v11 = vsel %vm68_vm14, %v834_v62, %v65_v9 }
 0xa20   :  { %v1026_v12 = vsel %vm71_vm0, %v73_v8, %v69_v11 }
 0xa21   :  { %v75_v13 = vmul.f32 %v1026_v12, %v60_v10 }
 0xa23   :  { %76 = vst [vmem:[#allocation2] sm:$0xff] %v75_v13 }
 0xa2a   :  { %v523_v15 = vld [vmem:[#allocation2 + $0x7] ss:$0 sm:$0xff]  ;;  %v545_v27 = vld [vmem:[#allocation2 + $0x6] ss:$0 sm:$0xff]  ;;  %v567_v42 = vld [vmem:[#allocation2 + $0x5] ss:$0 sm:$0xff] }
 0xa2b   :  { %v524_v16 = vxor.u32 2147483648, %v523_v15  ;;  %v546_v28 = vxor.u32 2147483648, %v545_v27  ;;  %v568_v44 = vxor.u32 2147483648, %v567_v42 }
 0xa2d   :  { %v528_v19 = vmul.f32 %v524_v16, %v170_v14 }
 0xa2f   :  { %529 = vadd.xlane.f32.xlu0 %v528_v19 }
 0xa5a   :  { %v484_v20 = vpop.xlane.xlu1 %483 }
 0xa5b   :  { %v485_v21 = vsel %vm473_vm6, %v484_v20, %v467_v53  ;;  %vm571_vm6 = vcmp.eq.s32.totalorder %v847_v1, 5 }
 0xa5c   :  { %v500_v22 = vmul.f32 %v488_v45, %v485_v21 }
 0xa5e   :  { %501 = vadd.xlane.f32.xlu1 %v500_v22 }
 0xa66   :  { %515 = vadd.xlane.f32.xlu1 %v514_v25 }
 0xa7e   :  { %v512_v2 = vpop.xlane.xlu0 %511 }
 0xa7f   :  { %v513_v7 = vsel %vm509_vm1, %v512_v2, %v495_v59 }
 0xa80   :  { %v532_v26 = vmul.f32 %v524_v16, %v513_v7 }
 0xa82   :  { %533 = vadd.xlane.f32.xlu1 %v532_v26 }
 0xaa2   :  { %v530_v30 = vpop.xlane.xlu0 %529 }
 0xaa3   :  { %v531_v31 = vsel %vm527_vm3, %v530_v30, %v170_v14  ;;  %v611_v14 = vld [vmem:[#allocation2 + $0x3] ss:$0 sm:$0xff] }
 0xaa4   :  { %v550_v32 = vmul.f32 %v546_v28, %v531_v31 }
 0xaa6   :  { %551 = vadd.xlane.f32.xlu1 %v550_v32 }
 0xad1   :  { %v502_v33 = vpop.xlane.xlu1 %501 }
 0xad2   :  { %v503_v34 = vsel %vm491_vm9, %v502_v33, %v485_v21  ;;  %vm615_vm9 = vcmp.eq.s32.totalorder %v847_v1, 3 }
 0xad3   :  { %v518_v35 = vmul.f32 %v506_v58, %v503_v34  ;;  %v589_v58 = vld [vmem:[#allocation2 + $0x4] ss:$0 sm:$0xff] }
 0xad4   :  { %v590_v60 = vxor.u32 2147483648, %v589_v58 }
 0xad5   :  { %519 = vadd.xlane.f32.xlu2 %v518_v35 }
 0xad9   :  { %v516_v36 = vpop.xlane.xlu1 %515 }
 0xada   :  { %v517_v37 = vsel %vm509_vm1, %v516_v36, %v499_v24 }
 0xadb   :  { %v536_v38 = vmul.f32 %v524_v16, %v517_v37 }
 0xadd   :  { %537 = vadd.xlane.f32.xlu2 %v536_v38 }
 0xaf5   :  { %v534_v39 = vpop.xlane.xlu1 %533 }
 0xaf6   :  { %v535_v40 = vsel %vm527_vm3, %v534_v39, %v513_v7 }
 0xaf7   :  { %v554_v41 = vmul.f32 %v546_v28, %v535_v40 }
 0xaf9   :  { %555 = vadd.xlane.f32.xlu2 %v554_v41 }
 0xb19   :  { %v552_v45 = vpop.xlane.xlu1 %551 }
 0xb1a   :  { %v553_v46 = vsel %vm549_vm4, %v552_v45, %v531_v31 }
 0xb1b   :  { %v572_v47 = vmul.f32 %v568_v44, %v553_v46 }
 0xb1d   :  { %573 = vadd.xlane.f32.xlu2 %v572_v47 }
 0xb48   :  { %v520_v48 = vpop.xlane.xlu2 %519 }
 0xb49   :  { %v521_v49 = vsel %vm509_vm1, %v520_v48, %v503_v34 }
 0xb4a   :  { %v540_v50 = vmul.f32 %v524_v16, %v521_v49  ;;  %v612_v16 = vxor.u32 2147483648, %v611_v14 }
 0xb4c   :  { %541 = vadd.xlane.f32.xlu0 %v540_v50 }
 0xb50   :  { %v538_v51 = vpop.xlane.xlu2 %537 }
 0xb51   :  { %v539_v52 = vsel %vm527_vm3, %v538_v51, %v517_v37 }
 0xb52   :  { %v558_v53 = vmul.f32 %v546_v28, %v539_v52 }
 0xb54   :  { %559 = vadd.xlane.f32.xlu0 %v558_v53 }
 0xb6c   :  { %v556_v55 = vpop.xlane.xlu2 %555 }
 0xb6d   :  { %v557_v56 = vsel %vm549_vm4, %v556_v55, %v535_v40 }
 0xb6e   :  { %v576_v57 = vmul.f32 %v568_v44, %v557_v56 }
 0xb70   :  { %577 = vadd.xlane.f32.xlu0 %v576_v57 }
 0xb90   :  { %v574_v59 = vpop.xlane.xlu2 %573 }
 0xb91   :  { %v575_v62 = vsel %vm571_vm6, %v574_v59, %v553_v46  ;;  %v676_v59 = vld [vmem:[#allocation2] ss:$0 sm:$0xff] }
 0xb92   :  { %v594_v63 = vmul.f32 %v590_v60, %v575_v62 }
 0xb94   :  { %595 = vadd.xlane.f32.xlu0 %v594_v63 }
 0xbbf   :  { %v542_v0 = vpop.xlane.xlu0 %541 }
 0xbc0   :  { %v543_v3 = vsel %vm527_vm3, %v542_v0, %v521_v49 }
 0xbc1   :  { %v562_v4 = vmul.f32 %v546_v28, %v543_v3  ;;  %v633_v28 = vld [vmem:[#allocation2 + $0x2] ss:$0 sm:$0xff] }
 0xbc2   :  { %v634_v31 = vxor.u32 2147483648, %v633_v28 }
 0xbc3   :  { %563 = vadd.xlane.f32.xlu1 %v562_v4 }
 0xbc7   :  { %v560_v5 = vpop.xlane.xlu0 %559 }
 0xbc8   :  { %v561_v8 = vsel %vm549_vm4, %v560_v5, %v539_v52 }
 0xbc9   :  { %v580_v9 = vmul.f32 %v568_v44, %v561_v8 }
 0xbcb   :  { %581 = vadd.xlane.f32.xlu1 %v580_v9 }
 0xbe3   :  { %v578_v10 = vpop.xlane.xlu0 %577 }
 0xbe4   :  { %v579_v11 = vsel %vm571_vm6, %v578_v10, %v557_v56 }
 0xbe5   :  { %v598_v13 = vmul.f32 %v590_v60, %v579_v11 }
 0xbe7   :  { %599 = vadd.xlane.f32.xlu1 %v598_v13 }
 0xc07   :  { %v596_v15 = vpop.xlane.xlu0 %595 }
 0xc08   :  { %v597_v19 = vsel %vm593_vm8, %v596_v15, %v575_v62  ;;  %v677_v62 = vxor.u32 2147483648, %v676_v59 }
 0xc09   :  { %v616_v20 = vmul.f32 %v612_v16, %v597_v19 }
 0xc0b   :  { %617 = vadd.xlane.f32.xlu1 %v616_v20 }
 0xc36   :  { %v564_v21 = vpop.xlane.xlu1 %563 }
 0xc37   :  { %v565_v22 = vsel %vm549_vm4, %v564_v21, %v543_v3 }
 0xc38   :  { %v584_v23 = vmul.f32 %v568_v44, %v565_v22  ;;  %v655_v44 = vld [vmem:[#allocation2 + $0x1] ss:$0 sm:$0xff] }
 0xc39   :  { %v656_v46 = vxor.u32 2147483648, %v655_v44 }
 0xc3a   :  { %585 = vadd.xlane.f32.xlu2 %v584_v23 }
 0xc3e   :  { %v582_v24 = vpop.xlane.xlu1 %581 }
 0xc3f   :  { %v583_v25 = vsel %vm571_vm6, %v582_v24, %v561_v8 }
 0xc40   :  { %v602_v2 = vmul.f32 %v590_v60, %v583_v25 }
 0xc42   :  { %603 = vadd.xlane.f32.xlu2 %v602_v2 }
 0xc5a   :  { %v600_v7 = vpop.xlane.xlu1 %599 }
 0xc5b   :  { %v601_v26 = vsel %vm593_vm8, %v600_v7, %v579_v11 }
 0xc5c   :  { %v620_v27 = vmul.f32 %v612_v16, %v601_v26 }
 0xc5e   :  { %621 = vadd.xlane.f32.xlu2 %v620_v27 }
 0xc7e   :  { %v618_v30 = vpop.xlane.xlu1 %617 }
 0xc7f   :  { %v619_v32 = vsel %vm615_vm9, %v618_v30, %v597_v19 }
 0xc80   :  { %v638_v33 = vmul.f32 %v634_v31, %v619_v32 }
 0xc82   :  { %639 = vadd.xlane.f32.xlu2 %v638_v33 }
 0xcad   :  { %v586_v34 = vpop.xlane.xlu2 %585 }
 0xcae   :  { %v587_v35 = vsel %vm571_vm6, %v586_v34, %v565_v22 }
 0xcaf   :  { %v606_v36 = vmul.f32 %v590_v60, %v587_v35 }
 0xcb1   :  { %607 = vadd.xlane.f32.xlu0 %v606_v36 }
 0xcb5   :  { %v604_v37 = vpop.xlane.xlu2 %603 }
 0xcb6   :  { %v605_v38 = vsel %vm593_vm8, %v604_v37, %v583_v25 }
 0xcb7   :  { %v624_v39 = vmul.f32 %v612_v16, %v605_v38 }
 0xcb9   :  { %625 = vadd.xlane.f32.xlu0 %v624_v39 }
 0xcd1   :  { %v622_v40 = vpop.xlane.xlu2 %621 }
 0xcd2   :  { %v623_v41 = vsel %vm615_vm9, %v622_v40, %v601_v26 }
 0xcd3   :  { %v642_v42 = vmul.f32 %v634_v31, %v623_v41 }
 0xcd5   :  { %643 = vadd.xlane.f32.xlu0 %v642_v42 }
 0xcf5   :  { %v640_v45 = vpop.xlane.xlu2 %639 }
 0xcf6   :  { %v641_v47 = vsel %vm637_vm10, %v640_v45, %v619_v32 }
 0xcf7   :  { %v660_v48 = vmul.f32 %v656_v46, %v641_v47 }
 0xcf9   :  { %661 = vadd.xlane.f32.xlu0 %v660_v48 }
 0xd24   :  { %v608_v49 = vpop.xlane.xlu0 %607 }
 0xd25   :  { %v609_v50 = vsel %vm593_vm8, %v608_v49, %v587_v35 }
 0xd26   :  { %v628_v51 = vmul.f32 %v612_v16, %v609_v50 }
 0xd28   :  { %629 = vadd.xlane.f32.xlu1 %v628_v51 }
 0xd2c   :  { %v626_v52 = vpop.xlane.xlu0 %625 }
 0xd2d   :  { %v627_v53 = vsel %vm615_vm9, %v626_v52, %v605_v38 }
 0xd2e   :  { %v646_v55 = vmul.f32 %v634_v31, %v627_v53 }
 0xd30   :  { %647 = vadd.xlane.f32.xlu1 %v646_v55 }
 0xd48   :  { %v644_v56 = vpop.xlane.xlu0 %643 }
 0xd49   :  { %v645_v57 = vsel %vm637_vm10, %v644_v56, %v623_v41 }
 0xd4a   :  { %v664_v58 = vmul.f32 %v656_v46, %v645_v57 }
 0xd4c   :  { %665 = vadd.xlane.f32.xlu1 %v664_v58 }
 0xd6c   :  { %v662_v60 = vpop.xlane.xlu0 %661 }
 0xd6d   :  { %v663_v63 = vsel %vm659_vm12, %v662_v60, %v641_v47 }
 0xd6e   :  { %v681_v0 = vmul.f32 %v677_v62, %v663_v63 }
 0xd70   :  { %682 = vadd.xlane.f32.xlu1 %v681_v0 }
 0xd9b   :  { %v630_v3 = vpop.xlane.xlu1 %629 }
 0xd9c   :  { %v631_v4 = vsel %vm615_vm9, %v630_v3, %v609_v50 }
 0xd9d   :  { %v650_v5 = vmul.f32 %v634_v31, %v631_v4 }
 0xd9f   :  { %651 = vadd.xlane.f32.xlu2 %v650_v5 }
 0xda3   :  { %v648_v8 = vpop.xlane.xlu1 %647 }
 0xda4   :  { %v649_v9 = vsel %vm637_vm10, %v648_v8, %v627_v53 }
 0xda5   :  { %v668_v10 = vmul.f32 %v656_v46, %v649_v9 }
 0xda7   :  { %669 = vadd.xlane.f32.xlu2 %v668_v10 }
 0xdbf   :  { %v666_v11 = vpop.xlane.xlu1 %665 }
 0xdc0   :  { %v667_v13 = vsel %vm659_vm12, %v666_v11, %v645_v57 }
 0xdc1   :  { %v685_v14 = vmul.f32 %v677_v62, %v667_v13 }
 0xdc3   :  { %686 = vadd.xlane.f32.xlu2 %v685_v14 }
 0xde3   :  { %v683_v15 = vpop.xlane.xlu1 %682 }
 0xde4   :  { %v684_v16 = vsel %vm680_vm13, %v683_v15, %v663_v63 }
 0xde5   :  { %v711_v19 = vmul.f32 %v684_v16, %v1026_v12 }
 0xde7   :  { %v713_v20 = vsel %vm66_vm11, %v684_v16, %v711_v19 }
 0xde8   :  { %807 = vst [vmem:[%s1142_s1] sm:$0xff] %v713_v20 }
 0xe12   :  { %v652_v21 = vpop.xlane.xlu2 %651 }
 0xe13   :  { %v653_v22 = vsel %vm637_vm10, %v652_v21, %v631_v4 }
 0xe14   :  { %v672_v23 = vmul.f32 %v656_v46, %v653_v22 }
 0xe16   :  { %673 = vadd.xlane.f32.xlu0 %v672_v23 }
 0xe1a   :  { %v670_v24 = vpop.xlane.xlu2 %669 }
 0xe1b   :  { %v671_v25 = vsel %vm659_vm12, %v670_v24, %v649_v9 }
 0xe1c   :  { %v689_v2 = vmul.f32 %v677_v62, %v671_v25 }
 0xe1e   :  { %690 = vadd.xlane.f32.xlu0 %v689_v2 }
 0xe36   :  { %v687_v12 = vpop.xlane.xlu2 %686 }
 0xe37   :  { %v688_v61 = vsel %vm680_vm13, %v687_v12, %v667_v13 }
 0xe38   :  { %v729_v7 = vmul.f32 %v688_v61, %v953_v29 }
 0xe3a   :  { %v731_v26 = vsel %vm95_vm7, %v688_v61, %v729_v7 }
 0xe3b   :  { %809 = vst [vmem:[%s1142_s1 + $0x8] sm:$0xff] %v731_v26 }
 0xe89   :  { %v674_v27 = vpop.xlane.xlu0 %673 }
 0xe8a   :  { %v675_v28 = vsel %vm659_vm12, %v674_v27, %v653_v22 }
 0xe8b   :  { %v693_v30 = vmul.f32 %v677_v62, %v675_v28 }
 0xe8d   :  { %694 = vadd.xlane.f32.xlu1 %v693_v30 }
 0xe91   :  { %v691_v31 = vpop.xlane.xlu0 %690 }
 0xe92   :  { %v692_v32 = vsel %vm680_vm13, %v691_v31, %v671_v25 }
 0xe93   :  { %v748_v33 = vmul.f32 %v692_v32, %v894_v54 }
 0xe95   :  { %v750_v18 = vsel %vm124_vm15, %v692_v32, %v748_v33 }
 0xe96   :  { %811 = vst [vmem:[%s1142_s1 + $0x10] sm:$0xff] %v750_v18 }
 0xf00   :  { %v695_v29 = vpop.xlane.xlu1 %694 }
 0xf01   :  { %v696_v34 = vsel %vm680_vm13, %v695_v29, %v675_v28 }
 0xf02   :  { %v767_v35 = vmul.f32 %v696_v34, %v869_v17 }
 0xf04   :  { %v769_v36 = vsel %vm153_vm5, %v696_v34, %v767_v35 }
 0xf05   :  { %813 = vst [vmem:[%s1142_s1 + $0x18] sm:$0xff] %v769_v36 }

// kernel: tile.8
= control target key start
LH: loop header
LB: loop body
LE: loop exit
PB: predicated region body
PF: predicated region fallthrough
CT: control target
= control target key end

     0   :  { %s22_s0 = inlined_call_operand.vmem [shape: f32[32], index: 0, kind: input, shape index: {}]   ;;  %s23_s1 = inlined_call_operand.vmem [shape: f32[4,32], index: 1, kind: output, shape index: {}]  }
   0x1   :  { %v4_v0 = vld [vmem:[%s22_s0] ss:$0 sm:$0xff] }
   0x2   :  { %5 = vst [vmem:[%s23_s1] sm:$0xf] %v4_v0 }

// kernel: tile.9
= control target key start
LH: loop header
LB: loop body
LE: loop exit
PB: predicated region body
PF: predicated region fallthrough
CT: control target
= control target key end

     0   :  { %s37_s8 = smov 32   ;;  %s38_s9 = smov 64   ;;  %vm7_vm0 = vcmask 261120   ;;  %vm13_vm1 = vcmask 1048320   ;;  %vm19_vm2 = vcmask 785920   ;;  %vm25_vm3 = vcmask 523520   ;;  %s55_s0 = inlined_call_operand.vmem [shape: f32[4,32], index: 0, kind: input, shape index: {}]   ;;  %s56_s1 = inlined_call_operand.vmem [shape: f32[1,128], index: 1, kind: output, shape index: {}]  }
   0x1   :  { %v4_v0 = vld [vmem:[%s55_s0] sm:$0xf]  ;;  %s36_s0 = smov 96  }
   0x2   :  { %5 = vst [vmem:[#allocation1] sm:$0xf] %v4_v0 }
   0x9   :  { %v10_v1 = vld [vmem:[#allocation1 + $0x3] sm:$0x1]   ;;  %v22_v2 = vld [vmem:[#allocation1 + $0x1] sm:$0x1]   ;;  %v16_v3 = vld [vmem:[#allocation1 + $0x2] sm:$0x1]  }
   0xa   :  { %11 = vrot.lane.b32.xlu0 %v10_v1, %s36_s0  ;;  %23 = vrot.lane.b32.xlu1 %v22_v2, %s37_s8  ;;  %v6_v4 = vld [vmem:[#allocation1] sm:$0x1]  }
   0xb   :  { %8 = vst.msk [vmem:[#allocation0] sm:$0x1] %vm7_vm0, %v6_v4  }
  0x12   :  { %17 = vrot.lane.b32.xlu0 %v16_v3, %s38_s9 }
  0x7c   :  { %v12_v5 = vpop.permute.xlu0 %11   ;;  %v24_v6 = vpop.permute.xlu1 %23  }
  0x7d   :  { %14 = vst.msk [vmem:[#allocation0] sm:$0x1] %vm13_vm1, %v12_v5  }
  0x84   :  { %v18_v7 = vpop.permute.xlu0 %17  }
  0x85   :  { %20 = vst.msk [vmem:[#allocation0] sm:$0x1] %vm19_vm2, %v18_v7  }
  0x86   :  { %26 = vst.msk [vmem:[#allocation0] sm:$0x1] %vm25_vm3, %v24_v6  }
  0x8d   :  { %v29_v8 = vld [vmem:[#allocation0] sm:$0x1] }
  0x8e   :  { %32 = vst [vmem:[%s56_s1] sm:$0x1] %v29_v8 }

// kernel: cayley_linear_forward.1
= control target key start
LH: loop header
LB: loop body
LE: loop exit
PB: predicated region body
PF: predicated region fallthrough
CT: control target
= control target key end

     0   :  { %s138_s1 = inlined_call_operand.vmem [shape: f32[128,128], index: 1, kind: input, shape index: {}]   ;;  %s139_s2 = inlined_call_operand.vmem [shape: f32[1,128], index: 2, kind: input, shape index: {}]   ;;  %s140_s0 = inlined_call_operand.vmem [shape: f32[2,128], index: 0, kind: input, shape index: {}]   ;;  %s141_s3 = inlined_call_operand.vmem [shape: f32[2,128], index: 3, kind: output, shape index: {}]  }
   0x1   :  { %v30_v0 = vld [vmem:[%s138_s1 + $0x78] sm:$0xff]  ;;  %v29_v1 = vld [vmem:[%s138_s1 + $0x70] sm:$0xff]  ;;  %v28_v2 = vld [vmem:[%s138_s1 + $0x68] sm:$0xff] }
   0x2   :  { %35 = vmatpush.msra.mxu0 %v30_v0  ;;  %v27_v3 = vld [vmem:[%s138_s1 + $0x60] sm:$0xff]  ;;  %v26_v4 = vld [vmem:[%s138_s1 + $0x58] sm:$0xff]  ;;  %v25_v5 = vld [vmem:[%s138_s1 + $0x50] sm:$0xff] }
   0x3   :  { %v24_v6 = vld [vmem:[%s138_s1 + $0x48] sm:$0xff]  ;;  %v23_v7 = vld [vmem:[%s138_s1 + $0x40] sm:$0xff]  ;;  %v22_v8 = vld [vmem:[%s138_s1 + $0x38] sm:$0xff] }
   0x4   :  { %36 = vmatpush.msra.mxu0 %v29_v1  ;;  %v21_v9 = vld [vmem:[%s138_s1 + $0x30] sm:$0xff]  ;;  %v20_v10 = vld [vmem:[%s138_s1 + $0x28] sm:$0xff]  ;;  %v19_v11 = vld [vmem:[%s138_s1 + $0x20] sm:$0xff] }
   0x5   :  { %v18_v12 = vld [vmem:[%s138_s1 + $0x18] sm:$0xff]  ;;  %v17_v13 = vld [vmem:[%s138_s1 + $0x10] sm:$0xff]  ;;  %v16_v14 = vld [vmem:[%s138_s1 + $0x8] sm:$0xff] }
   0x6   :  { %37 = vmatpush.msra.mxu0 %v28_v2  ;;  %v15_v15 = vld [vmem:[%s138_s1] sm:$0xff] }
   0x7   :  { %v14_v16 = vld [vmem:[%s140_s0] sm:$0x3] }
   0x8   :  { %38 = vmatpush.msra.mxu0 %v27_v3  ;;  %v60_v17 = vld [vmem:[%s139_s2] ss:$0 sm:$0xff] }
   0xa   :  { %39 = vmatpush.msra.mxu0 %v26_v4 }
   0xc   :  { %40 = vmatpush.msra.mxu0 %v25_v5 }
   0xe   :  { %41 = vmatpush.msra.mxu0 %v24_v6 }
  0x10   :  { %42 = vmatpush.msra.mxu0 %v23_v7 }
  0x12   :  { %43 = vmatpush.msra.mxu0 %v22_v8 }
  0x14   :  { %44 = vmatpush.msra.mxu0 %v21_v9 }
  0x16   :  { %45 = vmatpush.msra.mxu0 %v20_v10 }
  0x18   :  { %46 = vmatpush.msra.mxu0 %v19_v11 }
  0x1a   :  { %47 = vmatpush.msra.mxu0 %v18_v12 }
  0x1c   :  { %48 = vmatpush.msra.mxu0 %v17_v13 }
  0x1e   :  { %49 = vmatpush.msra.mxu0 %v16_v14 }
  0x20   :  { %50 = vmatpush.msra.mxu0 %v15_v15 }
  0x21   :  { %51 = vmatmul.f32.vlgmr.msra.gmra.mxu0 %v14_v16 }
  0x9e   :  { %v52_v18 = vpop.f32.mrf.mxu0 }
  0x9f   :  { %v53_v19 = vadd.f32 %v60_v17, %v52_v18 }
  0xa1   :  { %55 = vst [vmem:[%s141_s3] sm:$0x3] %v53_v19 }

</bundles_post_ra>
